<compile_context>
chip_gen: v5e
topology: v5e:2x2
jax: 0.10.0
libtpu: 0.0.40
codegen_flags: <defaults>
</compile_context>

<pallas_src>
import math

import jax
import jax.numpy as jnp
from jax.experimental import pallas as pl
from jax.experimental.pallas import tpu as pltpu

# ------------------------- small synthetic config ---------------------------
B, S = 2, 8           # batch, sequence length
H = 32                # hidden size (stand-in for roberta-base 768)
NH = 4                # attention heads
HD = H // NH          # head dim
FF = 64               # FFN intermediate size
NUM_LAYERS = 2        # encoder layers
VOCAB = 100           # vocab size
FC1 = 256             # head hidden size (matches the module)
NUM_LABELS = 3        # num_labels
OUT_PAD = 128         # lane-padded head output width (sliced to NUM_LABELS outside)
EPS = 1e-5

# TODO(synk): at these synthetic sizes every matmul has M<=8; the kernel stays
# latency-bound regardless of micro-tuning.  Scaling B*S >= 128 (real batches)
# is the only change that materially moves MXU utilization.


# ------------------------------ kernel helpers -------------------------------
def _gelu(x):
    # TODO(synk): tanh approximation; HF RoBERTa uses exact erf GELU.
    c = math.sqrt(2.0 / math.pi)
    return 0.5 * x * (1.0 + jnp.tanh(c * (x + 0.044715 * x * x * x)))


def _layernorm(x, gamma, beta):
    mu = jnp.mean(x, axis=-1, keepdims=True)
    var = jnp.mean((x - mu) ** 2, axis=-1, keepdims=True)
    return (x - mu) * jax.lax.rsqrt(var + EPS) * gamma + beta


# ------------------- fused encoder-stack + classifier kernel -----------------
# pvec rows: 0=bo, 1=ln1_gamma, 2=ln1_beta, 3=bf2, 4=ln2_gamma, 5=ln2_beta
def bert_fused_kernel(
        x_ref, bias_ref,
        wqkv_ref, bqkv_ref, wo_ref, wf1_ref, bf1_ref, wf2_ref, pvec_ref,
        fc1w_ref, fc1b_ref, fc2w_ref, fc2b_ref,
        out_ref):
    xf = x_ref[0]            # (S, H) f32 -- this batch element's activations
    bias = bias_ref[0]       # (1, S) f32 additive key mask (broadcast over queries)
    scale = 1.0 / math.sqrt(HD)

    # TODO(synk): at real roberta-base dims (H=768, FF=3072, L=12) this static
    # unroll must go back to a streamed grid=(L,) "arbitrary" axis with
    # per-layer weight BlockSpecs and vmem_limit_bytes budgeting (v7x: 64 MiB).
    for l in range(NUM_LAYERS):
        x_bf = xf.astype(jnp.bfloat16)
        attn = jnp.zeros((S, H), jnp.float32)

        for h in range(NH):
            # Head-major per-head projections straight off the MXU: no lane
            # slicing of a fused [*, 3H] qkv vector.
            def proj(j, h=h):
                idx = j * NH + h
                w = wqkv_ref[l, idx]                       # (H, HD) bf16
                bvec = bqkv_ref[l, idx:idx + 1, :]         # (1, HD) f32
                return jnp.dot(x_bf, w,
                               preferred_element_type=jnp.float32) + bvec

            qh, kh, vh = proj(0), proj(1), proj(2)         # each (S, HD) f32

            s = jnp.einsum('qd,kd->qk',
                           qh.astype(jnp.bfloat16), kh.astype(jnp.bfloat16),
                           preferred_element_type=jnp.float32) * scale
            s = s + bias
            s = s - jnp.max(s, axis=-1, keepdims=True)
            p = jnp.exp(s)
            p = p * pl.reciprocal(jnp.sum(p, axis=-1, keepdims=True),
                                  approx=True)
            ctx_h = jnp.dot(p.astype(jnp.bfloat16), vh.astype(jnp.bfloat16),
                            preferred_element_type=jnp.float32)   # (S, HD)
            # Per-head output projection accumulated on the MXU (replaces the
            # jnp.concatenate(ctx_heads) + single wo matmul -> no XLU shuffles).
            attn = attn + jnp.dot(ctx_h.astype(jnp.bfloat16), wo_ref[l, h],
                                  preferred_element_type=jnp.float32)

        attn = attn + pvec_ref[l, 0:1, :]                          # bo
        h1 = _layernorm(xf + attn, pvec_ref[l, 1:2, :], pvec_ref[l, 2:3, :])

        ff = jnp.dot(h1.astype(jnp.bfloat16), wf1_ref[l],
                     preferred_element_type=jnp.float32) + bf1_ref[l]
        ff = _gelu(ff)
        ff = jnp.dot(ff.astype(jnp.bfloat16), wf2_ref[l],
                     preferred_element_type=jnp.float32) + pvec_ref[l, 3:4, :]
        xf = _layernorm(h1 + ff, pvec_ref[l, 4:5, :], pvec_ref[l, 5:6, :])

    # --- classifier head: pooled_output = last_hidden_state[:, 0] ---
    pooled = xf[0:1, :]                                            # (1, H)
    hh = jnp.dot(pooled.astype(jnp.bfloat16), fc1w_ref[...],
                 preferred_element_type=jnp.float32) + fc1b_ref[...]
    hh = jnp.maximum(hh, 0.0)                                      # ReLU
    # nn.Dropout(0.3): identity at inference time.
    logits = jnp.dot(hh.astype(jnp.bfloat16), fc2w_ref[...],
                     preferred_element_type=jnp.float32) + fc2b_ref[...]
    out_ref[0] = 1.0 / (1.0 + jnp.exp(-logits))                    # Sigmoid (lane-padded)


def _fixed_spec(shape):
    nd = len(shape)
    return pl.BlockSpec(tuple(shape), lambda b: (0,) * nd)


def bert_encoder_and_head(x, bias, params):
    args = (x, bias,
            params["wqkv"], params["bqkv"], params["wo"],
            params["wf1"], params["bf1"], params["wf2"], params["pvec"],
            params["fc1_w"], params["fc1_b"], params["fc2_w"], params["fc2_b"])

    in_specs = [
        pl.BlockSpec((1, S, H), lambda b: (b, 0, 0)),          # embedded input
        pl.BlockSpec((1, 1, S), lambda b: (b, 0, 0)),          # attention bias
        _fixed_spec((NUM_LAYERS, 3 * NH, H, HD)),              # wqkv (head-major)
        _fixed_spec((NUM_LAYERS, 3 * NH, HD)),                 # bqkv (packed)
        _fixed_spec((NUM_LAYERS, NH, HD, H)),                  # wo (per head)
        _fixed_spec((NUM_LAYERS, H, FF)),                      # wf1
        _fixed_spec((NUM_LAYERS, 1, FF)),                      # bf1
        _fixed_spec((NUM_LAYERS, FF, H)),                      # wf2
        _fixed_spec((NUM_LAYERS, 6, H)),                       # packed small params
        _fixed_spec((H, FC1)),                                 # fc1_w
        _fixed_spec((1, FC1)),                                 # fc1_b
        _fixed_spec((FC1, OUT_PAD)),                           # fc2_w (lane-padded)
        _fixed_spec((1, OUT_PAD)),                             # fc2_b (lane-padded)
    ]

    out = pl.pallas_call(
        bert_fused_kernel,
        out_shape=jax.ShapeDtypeStruct((B, 1, OUT_PAD), jnp.float32),
        grid=(B,),
        in_specs=in_specs,
        out_specs=pl.BlockSpec((1, 1, OUT_PAD), lambda b: (b, 0, 0)),
        compiler_params=pltpu.CompilerParams(
            dimension_semantics=("parallel",)),     # batch axis -> 2 TCs on v7x
    )(*args)
    return out[:, 0, :NUM_LABELS]


# ------------------------------- parameter init ------------------------------
def init_params(key):
    std = 0.02

    def nrm(k, shape):
        return jax.random.normal(k, shape, jnp.float32) * std

    keys = jax.random.split(key, 8)

    fc2_full = jnp.zeros((FC1, OUT_PAD), jnp.float32).at[:, :NUM_LABELS].set(
        nrm(keys[7], (FC1, NUM_LABELS)))

    # packed per-layer f32 params: 0=bo, 1=ln1_g, 2=ln1_b, 3=bf2, 4=ln2_g, 5=ln2_b
    pvec = jnp.zeros((NUM_LAYERS, 6, H), jnp.float32)
    pvec = pvec.at[:, 1, :].set(1.0)
    pvec = pvec.at[:, 4, :].set(1.0)

    params = {
        # embeddings (plain-JAX glue)
        "tok_emb": nrm(keys[0], (VOCAB, H)),
        "pos_emb": nrm(keys[1], (S, H)),
        "emb_ln_g": jnp.ones((H,), jnp.float32),
        "emb_ln_b": jnp.zeros((H,), jnp.float32),
        # encoder weights, head-major layouts; matmul weights bf16 (f32 accum)
        "wqkv": nrm(keys[2], (NUM_LAYERS, 3 * NH, H, HD)).astype(jnp.bfloat16),
        "bqkv": jnp.zeros((NUM_LAYERS, 3 * NH, HD), jnp.float32),
        "wo": nrm(keys[3], (NUM_LAYERS, NH, HD, H)).astype(jnp.bfloat16),
        "wf1": nrm(keys[4], (NUM_LAYERS, H, FF)).astype(jnp.bfloat16),
        "bf1": jnp.zeros((NUM_LAYERS, 1, FF), jnp.float32),
        "wf2": nrm(keys[5], (NUM_LAYERS, FF, H)).astype(jnp.bfloat16),
        "pvec": pvec,
        # classifier head; fc2 output lane-padded to OUT_PAD
        "fc1_w": nrm(keys[6], (H, FC1)).astype(jnp.bfloat16),
        "fc1_b": jnp.zeros((1, FC1), jnp.float32),
        "fc2_w": fc2_full.astype(jnp.bfloat16),
        "fc2_b": jnp.zeros((1, OUT_PAD), jnp.float32),
    }
    return params


# ---------------------------------- forward ----------------------------------
@jax.jit
def bert_model_forward(params, input_ids, attention_mask):
    # --- embeddings (glue: gather + LN in plain JAX) ---
    # TODO(synk): RoBERTa offsets position ids by padding_idx+1; simplified to 0..S-1.
    x = params["tok_emb"][input_ids] + params["pos_emb"][None, :, :]   # [B, S, H]
    mu = jnp.mean(x, axis=-1, keepdims=True)
    var = jnp.mean((x - mu) ** 2, axis=-1, keepdims=True)
    x = (x - mu) * jax.lax.rsqrt(var + EPS) * params["emb_ln_g"] + params["emb_ln_b"]

    # additive attention (key) bias, hoisted out of the kernel
    bias = ((attention_mask.astype(jnp.float32) - 1.0) * 1e9).reshape(B, 1, S)

    # --- fused encoder stack + fc1->relu->fc2->sigmoid head (single Pallas call) ---
    return bert_encoder_and_head(x, bias, params)


# ------------------------------------ main ------------------------------------
if __name__ == "__main__":
    key = jax.random.PRNGKey(0)
    k_param, k_ids = jax.random.split(key)

    params = init_params(k_param)

    input_ids = jax.random.randint(k_ids, (B, S), 0, VOCAB, dtype=jnp.int32)
    attention_mask = jnp.ones((B, S), dtype=jnp.int32)
    attention_mask = attention_mask.at[1, S - 2:].set(0)   # pad tail of batch 1

    out = bert_model_forward(params, input_ids, attention_mask)
    out = jax.block_until_ready(out)

    assert out.shape == (B, NUM_LABELS)
    assert bool(jnp.all(jnp.isfinite(out)))
    assert bool(jnp.all((out >= 0.0) & (out <= 1.0)))
    print("KERNEL_OK")
</pallas_src>

<mosaic_0001>
module attributes {stable_mosaic.version = 11 : i64} {
  func.func @bert_fused_kernel(%arg0: i32, %arg1: memref<1x8x32xf32, #tpu.memory_space<vmem>>, %arg2: memref<1x1x8xf32, #tpu.memory_space<vmem>>, %arg3: memref<2x12x32x8xbf16, #tpu.memory_space<vmem>>, %arg4: memref<2x12x8xf32, #tpu.memory_space<vmem>>, %arg5: memref<2x4x8x32xbf16, #tpu.memory_space<vmem>>, %arg6: memref<2x32x64xbf16, #tpu.memory_space<vmem>>, %arg7: memref<2x1x64xf32, #tpu.memory_space<vmem>>, %arg8: memref<2x64x32xbf16, #tpu.memory_space<vmem>>, %arg9: memref<2x6x32xf32, #tpu.memory_space<vmem>>, %arg10: memref<32x256xbf16, #tpu.memory_space<vmem>>, %arg11: memref<1x256xf32, #tpu.memory_space<vmem>>, %arg12: memref<256x128xbf16, #tpu.memory_space<vmem>>, %arg13: memref<1x128xf32, #tpu.memory_space<vmem>>, %arg14: memref<1x1x128xf32, #tpu.memory_space<vmem>>) attributes {dimension_semantics = [#tpu.dimension_semantics<parallel>], iteration_bounds = array<i64: 2>, scalar_prefetch = 0 : i64, scratch_operands = 0 : i64, tpu.core_type = #tpu.core_type<tc>, window_params = [{transform_indices = @transform_0, window_bounds = array<i64: 1, 8, 32>}, {transform_indices = @transform_1, window_bounds = array<i64: 1, 1, 8>}, {pipeline_mode = #tpu.pipeline_mode<synchronous>, transform_indices = @transform_2, window_bounds = array<i64: 2, 12, 32, 8>}, {pipeline_mode = #tpu.pipeline_mode<synchronous>, transform_indices = @transform_3, window_bounds = array<i64: 2, 12, 8>}, {pipeline_mode = #tpu.pipeline_mode<synchronous>, transform_indices = @transform_4, window_bounds = array<i64: 2, 4, 8, 32>}, {pipeline_mode = #tpu.pipeline_mode<synchronous>, transform_indices = @transform_5, window_bounds = array<i64: 2, 32, 64>}, {pipeline_mode = #tpu.pipeline_mode<synchronous>, transform_indices = @transform_6, window_bounds = array<i64: 2, 1, 64>}, {pipeline_mode = #tpu.pipeline_mode<synchronous>, transform_indices = @transform_7, window_bounds = array<i64: 2, 64, 32>}, {pipeline_mode = #tpu.pipeline_mode<synchronous>, transform_indices = @transform_8, window_bounds = array<i64: 2, 6, 32>}, {pipeline_mode = #tpu.pipeline_mode<synchronous>, transform_indices = @transform_9, window_bounds = array<i64: 32, 256>}, {pipeline_mode = #tpu.pipeline_mode<synchronous>, transform_indices = @transform_10, window_bounds = array<i64: 1, 256>}, {pipeline_mode = #tpu.pipeline_mode<synchronous>, transform_indices = @transform_11, window_bounds = array<i64: 256, 128>}, {pipeline_mode = #tpu.pipeline_mode<synchronous>, transform_indices = @transform_12, window_bounds = array<i64: 1, 128>}, {transform_indices = @transform_13, window_bounds = array<i64: 1, 1, 128>}]} {
    %c0 = arith.constant 0 : index
    %c0_0 = arith.constant 0 : index
    %c0_1 = arith.constant 0 : index
    %0 = vector.load %arg1[%c0, %c0_0, %c0_1] : memref<1x8x32xf32, #tpu.memory_space<vmem>>, vector<1x8x32xf32>
    %1 = vector.shape_cast %0 : vector<1x8x32xf32> to vector<8x32xf32>
    %c0_2 = arith.constant 0 : index
    %c0_3 = arith.constant 0 : index
    %c0_4 = arith.constant 0 : index
    %2 = vector.load %arg2[%c0_2, %c0_3, %c0_4] : memref<1x1x8xf32, #tpu.memory_space<vmem>>, vector<1x1x8xf32>
    %3 = vector.shape_cast %2 : vector<1x1x8xf32> to vector<1x8xf32>
    %4 = arith.truncf %1 : vector<8x32xf32> to vector<8x32xbf16>
    %cst = arith.constant 0.000000e+00 : f32
    %5 = vector.broadcast %cst : f32 to vector<8x32xf32>
    %c0_5 = arith.constant 0 : index
    %c0_6 = arith.constant 0 : index
    %c0_7 = arith.constant 0 : index
    %c0_8 = arith.constant 0 : index
    %6 = vector.load %arg3[%c0_5, %c0_6, %c0_7, %c0_8] : memref<2x12x32x8xbf16, #tpu.memory_space<vmem>>, vector<1x1x32x8xbf16>
    %7 = vector.shape_cast %6 : vector<1x1x32x8xbf16> to vector<32x8xbf16>
    %c0_9 = arith.constant 0 : index
    %c0_10 = arith.constant 0 : index
    %c0_11 = arith.constant 0 : index
    %8 = vector.load %arg4[%c0_9, %c0_10, %c0_11] : memref<2x12x8xf32, #tpu.memory_space<vmem>>, vector<1x1x8xf32>
    %9 = vector.shape_cast %8 : vector<1x1x8xf32> to vector<1x8xf32>
    %cst_12 = arith.constant dense<0.000000e+00> : vector<8x8xf32>
    %10 = tpu.matmul %4, %7, %cst_12 {dimension_numbers = #tpu.dot_dimension_numbers<[1], [0], [0], [1], [0, 0, 1, 1], [], []>} : vector<8x32xbf16>, vector<32x8xbf16>, vector<8x8xf32> -> vector<8x8xf32>
    %11 = vector.broadcast %9 : vector<1x8xf32> to vector<8x8xf32>
    %12 = arith.addf %10, %11 : vector<8x8xf32>
    %c0_13 = arith.constant 0 : index
    %c4 = arith.constant 4 : index
    %c0_14 = arith.constant 0 : index
    %c0_15 = arith.constant 0 : index
    %13 = vector.load %arg3[%c0_13, %c4, %c0_14, %c0_15] : memref<2x12x32x8xbf16, #tpu.memory_space<vmem>>, vector<1x1x32x8xbf16>
    %14 = vector.shape_cast %13 : vector<1x1x32x8xbf16> to vector<32x8xbf16>
    %c0_16 = arith.constant 0 : index
    %c4_17 = arith.constant 4 : index
    %c0_18 = arith.constant 0 : index
    %15 = vector.load %arg4[%c0_16, %c4_17, %c0_18] : memref<2x12x8xf32, #tpu.memory_space<vmem>>, vector<1x1x8xf32>
    %16 = vector.shape_cast %15 : vector<1x1x8xf32> to vector<1x8xf32>
    %cst_19 = arith.constant dense<0.000000e+00> : vector<8x8xf32>
    %17 = tpu.matmul %4, %14, %cst_19 {dimension_numbers = #tpu.dot_dimension_numbers<[1], [0], [0], [1], [0, 0, 1, 1], [], []>} : vector<8x32xbf16>, vector<32x8xbf16>, vector<8x8xf32> -> vector<8x8xf32>
    %18 = vector.broadcast %16 : vector<1x8xf32> to vector<8x8xf32>
    %19 = arith.addf %17, %18 : vector<8x8xf32>
    %c0_20 = arith.constant 0 : index
    %c8 = arith.constant 8 : index
    %c0_21 = arith.constant 0 : index
    %c0_22 = arith.constant 0 : index
    %20 = vector.load %arg3[%c0_20, %c8, %c0_21, %c0_22] : memref<2x12x32x8xbf16, #tpu.memory_space<vmem>>, vector<1x1x32x8xbf16>
    %21 = vector.shape_cast %20 : vector<1x1x32x8xbf16> to vector<32x8xbf16>
    %c0_23 = arith.constant 0 : index
    %c8_24 = arith.constant 8 : index
    %c0_25 = arith.constant 0 : index
    %22 = vector.load %arg4[%c0_23, %c8_24, %c0_25] : memref<2x12x8xf32, #tpu.memory_space<vmem>>, vector<1x1x8xf32>
    %23 = vector.shape_cast %22 : vector<1x1x8xf32> to vector<1x8xf32>
    %cst_26 = arith.constant dense<0.000000e+00> : vector<8x8xf32>
    %24 = tpu.matmul %4, %21, %cst_26 {dimension_numbers = #tpu.dot_dimension_numbers<[1], [0], [0], [1], [0, 0, 1, 1], [], []>} : vector<8x32xbf16>, vector<32x8xbf16>, vector<8x8xf32> -> vector<8x8xf32>
    %25 = vector.broadcast %23 : vector<1x8xf32> to vector<8x8xf32>
    %26 = arith.addf %24, %25 : vector<8x8xf32>
    %27 = arith.truncf %12 : vector<8x8xf32> to vector<8x8xbf16>
    %28 = arith.truncf %19 : vector<8x8xf32> to vector<8x8xbf16>
    "tpu.trace_start"() <{level = 10 : i32, message = "qd,kd->qk"}> : () -> ()
    %cst_27 = arith.constant dense<0.000000e+00> : vector<8x8xf32>
    %29 = tpu.matmul %27, %28, %cst_27 {dimension_numbers = #tpu.dot_dimension_numbers<[1], [1], [0], [0], [0, 0, 1, 0], [], []>} : vector<8x8xbf16>, vector<8x8xbf16>, vector<8x8xf32> -> vector<8x8xf32>
    "tpu.trace_stop"() : () -> ()
    %cst_28 = arith.constant 0.353553385 : f32
    %30 = vector.broadcast %cst_28 : f32 to vector<8x8xf32>
    %31 = arith.mulf %29, %30 : vector<8x8xf32>
    %32 = vector.broadcast %3 : vector<1x8xf32> to vector<8x8xf32>
    %33 = arith.addf %31, %32 : vector<8x8xf32>
    %cst_29 = arith.constant dense<0xFF800000> : vector<8xf32>
    %34 = vector.multi_reduction <maximumf>, %33, %cst_29 [1] : vector<8x8xf32> to vector<8xf32>
    %35 = vector.shape_cast %34 : vector<8xf32> to vector<8x1xf32>
    %36 = vector.broadcast %35 : vector<8x1xf32> to vector<8x8xf32>
    %37 = arith.subf %33, %36 : vector<8x8xf32>
    %38 = math.exp %37 : vector<8x8xf32>
    %cst_30 = arith.constant dense<0.000000e+00> : vector<8xf32>
    %39 = vector.multi_reduction <add>, %38, %cst_30 [1] : vector<8x8xf32> to vector<8xf32>
    %40 = vector.shape_cast %39 : vector<8xf32> to vector<8x1xf32>
    %41 = tpu.reciprocal %40 {approx = true} : vector<8x1xf32> -> vector<8x1xf32>
    %42 = vector.broadcast %41 : vector<8x1xf32> to vector<8x8xf32>
    %43 = arith.mulf %38, %42 : vector<8x8xf32>
    %44 = arith.truncf %43 : vector<8x8xf32> to vector<8x8xbf16>
    %45 = arith.truncf %26 : vector<8x8xf32> to vector<8x8xbf16>
    %cst_31 = arith.constant dense<0.000000e+00> : vector<8x8xf32>
    %46 = tpu.matmul %44, %45, %cst_31 {dimension_numbers = #tpu.dot_dimension_numbers<[1], [0], [0], [1], [0, 0, 1, 1], [], []>} : vector<8x8xbf16>, vector<8x8xbf16>, vector<8x8xf32> -> vector<8x8xf32>
    %47 = arith.truncf %46 : vector<8x8xf32> to vector<8x8xbf16>
    %c0_32 = arith.constant 0 : index
    %c0_33 = arith.constant 0 : index
    %c0_34 = arith.constant 0 : index
    %c0_35 = arith.constant 0 : index
    %48 = vector.load %arg5[%c0_32, %c0_33, %c0_34, %c0_35] : memref<2x4x8x32xbf16, #tpu.memory_space<vmem>>, vector<1x1x8x32xbf16>
    %49 = vector.shape_cast %48 : vector<1x1x8x32xbf16> to vector<8x32xbf16>
    %cst_36 = arith.constant dense<0.000000e+00> : vector<8x32xf32>
    %50 = tpu.matmul %47, %49, %cst_36 {dimension_numbers = #tpu.dot_dimension_numbers<[1], [0], [0], [1], [0, 0, 1, 1], [], []>} : vector<8x8xbf16>, vector<8x32xbf16>, vector<8x32xf32> -> vector<8x32xf32>
    %51 = arith.addf %5, %50 : vector<8x32xf32>
    %c0_37 = arith.constant 0 : index
    %c1 = arith.constant 1 : index
    %c0_38 = arith.constant 0 : index
    %c0_39 = arith.constant 0 : index
    %52 = vector.load %arg3[%c0_37, %c1, %c0_38, %c0_39] : memref<2x12x32x8xbf16, #tpu.memory_space<vmem>>, vector<1x1x32x8xbf16>
    %53 = vector.shape_cast %52 : vector<1x1x32x8xbf16> to vector<32x8xbf16>
    %c0_40 = arith.constant 0 : index
    %c1_41 = arith.constant 1 : index
    %c0_42 = arith.constant 0 : index
    %54 = vector.load %arg4[%c0_40, %c1_41, %c0_42] : memref<2x12x8xf32, #tpu.memory_space<vmem>>, vector<1x1x8xf32>
    %55 = vector.shape_cast %54 : vector<1x1x8xf32> to vector<1x8xf32>
    %cst_43 = arith.constant dense<0.000000e+00> : vector<8x8xf32>
    %56 = tpu.matmul %4, %53, %cst_43 {dimension_numbers = #tpu.dot_dimension_numbers<[1], [0], [0], [1], [0, 0, 1, 1], [], []>} : vector<8x32xbf16>, vector<32x8xbf16>, vector<8x8xf32> -> vector<8x8xf32>
    %57 = vector.broadcast %55 : vector<1x8xf32> to vector<8x8xf32>
    %58 = arith.addf %56, %57 : vector<8x8xf32>
    %c0_44 = arith.constant 0 : index
    %c5 = arith.constant 5 : index
    %c0_45 = arith.constant 0 : index
    %c0_46 = arith.constant 0 : index
    %59 = vector.load %arg3[%c0_44, %c5, %c0_45, %c0_46] : memref<2x12x32x8xbf16, #tpu.memory_space<vmem>>, vector<1x1x32x8xbf16>
    %60 = vector.shape_cast %59 : vector<1x1x32x8xbf16> to vector<32x8xbf16>
    %c0_47 = arith.constant 0 : index
    %c5_48 = arith.constant 5 : index
    %c0_49 = arith.constant 0 : index
    %61 = vector.load %arg4[%c0_47, %c5_48, %c0_49] : memref<2x12x8xf32, #tpu.memory_space<vmem>>, vector<1x1x8xf32>
    %62 = vector.shape_cast %61 : vector<1x1x8xf32> to vector<1x8xf32>
    %cst_50 = arith.constant dense<0.000000e+00> : vector<8x8xf32>
    %63 = tpu.matmul %4, %60, %cst_50 {dimension_numbers = #tpu.dot_dimension_numbers<[1], [0], [0], [1], [0, 0, 1, 1], [], []>} : vector<8x32xbf16>, vector<32x8xbf16>, vector<8x8xf32> -> vector<8x8xf32>
    %64 = vector.broadcast %62 : vector<1x8xf32> to vector<8x8xf32>
    %65 = arith.addf %63, %64 : vector<8x8xf32>
    %c0_51 = arith.constant 0 : index
    %c9 = arith.constant 9 : index
    %c0_52 = arith.constant 0 : index
    %c0_53 = arith.constant 0 : index
    %66 = vector.load %arg3[%c0_51, %c9, %c0_52, %c0_53] : memref<2x12x32x8xbf16, #tpu.memory_space<vmem>>, vector<1x1x32x8xbf16>
    %67 = vector.shape_cast %66 : vector<1x1x32x8xbf16> to vector<32x8xbf16>
    %c0_54 = arith.constant 0 : index
    %c9_55 = arith.constant 9 : index
    %c0_56 = arith.constant 0 : index
    %68 = vector.load %arg4[%c0_54, %c9_55, %c0_56] : memref<2x12x8xf32, #tpu.memory_space<vmem>>, vector<1x1x8xf32>
    %69 = vector.shape_cast %68 : vector<1x1x8xf32> to vector<1x8xf32>
    %cst_57 = arith.constant dense<0.000000e+00> : vector<8x8xf32>
    %70 = tpu.matmul %4, %67, %cst_57 {dimension_numbers = #tpu.dot_dimension_numbers<[1], [0], [0], [1], [0, 0, 1, 1], [], []>} : vector<8x32xbf16>, vector<32x8xbf16>, vector<8x8xf32> -> vector<8x8xf32>
    %71 = vector.broadcast %69 : vector<1x8xf32> to vector<8x8xf32>
    %72 = arith.addf %70, %71 : vector<8x8xf32>
    %73 = arith.truncf %58 : vector<8x8xf32> to vector<8x8xbf16>
    %74 = arith.truncf %65 : vector<8x8xf32> to vector<8x8xbf16>
    "tpu.trace_start"() <{level = 10 : i32, message = "qd,kd->qk"}> : () -> ()
    %cst_58 = arith.constant dense<0.000000e+00> : vector<8x8xf32>
    %75 = tpu.matmul %73, %74, %cst_58 {dimension_numbers = #tpu.dot_dimension_numbers<[1], [1], [0], [0], [0, 0, 1, 0], [], []>} : vector<8x8xbf16>, vector<8x8xbf16>, vector<8x8xf32> -> vector<8x8xf32>
    "tpu.trace_stop"() : () -> ()
    %cst_59 = arith.constant 0.353553385 : f32
    %76 = vector.broadcast %cst_59 : f32 to vector<8x8xf32>
    %77 = arith.mulf %75, %76 : vector<8x8xf32>
    %78 = vector.broadcast %3 : vector<1x8xf32> to vector<8x8xf32>
    %79 = arith.addf %77, %78 : vector<8x8xf32>
    %cst_60 = arith.constant dense<0xFF800000> : vector<8xf32>
    %80 = vector.multi_reduction <maximumf>, %79, %cst_60 [1] : vector<8x8xf32> to vector<8xf32>
    %81 = vector.shape_cast %80 : vector<8xf32> to vector<8x1xf32>
    %82 = vector.broadcast %81 : vector<8x1xf32> to vector<8x8xf32>
    %83 = arith.subf %79, %82 : vector<8x8xf32>
    %84 = math.exp %83 : vector<8x8xf32>
    %cst_61 = arith.constant dense<0.000000e+00> : vector<8xf32>
    %85 = vector.multi_reduction <add>, %84, %cst_61 [1] : vector<8x8xf32> to vector<8xf32>
    %86 = vector.shape_cast %85 : vector<8xf32> to vector<8x1xf32>
    %87 = tpu.reciprocal %86 {approx = true} : vector<8x1xf32> -> vector<8x1xf32>
    %88 = vector.broadcast %87 : vector<8x1xf32> to vector<8x8xf32>
    %89 = arith.mulf %84, %88 : vector<8x8xf32>
    %90 = arith.truncf %89 : vector<8x8xf32> to vector<8x8xbf16>
    %91 = arith.truncf %72 : vector<8x8xf32> to vector<8x8xbf16>
    %cst_62 = arith.constant dense<0.000000e+00> : vector<8x8xf32>
    %92 = tpu.matmul %90, %91, %cst_62 {dimension_numbers = #tpu.dot_dimension_numbers<[1], [0], [0], [1], [0, 0, 1, 1], [], []>} : vector<8x8xbf16>, vector<8x8xbf16>, vector<8x8xf32> -> vector<8x8xf32>
    %93 = arith.truncf %92 : vector<8x8xf32> to vector<8x8xbf16>
    %c0_63 = arith.constant 0 : index
    %c1_64 = arith.constant 1 : index
    %c0_65 = arith.constant 0 : index
    %c0_66 = arith.constant 0 : index
    %94 = vector.load %arg5[%c0_63, %c1_64, %c0_65, %c0_66] : memref<2x4x8x32xbf16, #tpu.memory_space<vmem>>, vector<1x1x8x32xbf16>
    %95 = vector.shape_cast %94 : vector<1x1x8x32xbf16> to vector<8x32xbf16>
    %cst_67 = arith.constant dense<0.000000e+00> : vector<8x32xf32>
    %96 = tpu.matmul %93, %95, %cst_67 {dimension_numbers = #tpu.dot_dimension_numbers<[1], [0], [0], [1], [0, 0, 1, 1], [], []>} : vector<8x8xbf16>, vector<8x32xbf16>, vector<8x32xf32> -> vector<8x32xf32>
    %97 = arith.addf %51, %96 : vector<8x32xf32>
    %c0_68 = arith.constant 0 : index
    %c2 = arith.constant 2 : index
    %c0_69 = arith.constant 0 : index
    %c0_70 = arith.constant 0 : index
    %98 = vector.load %arg3[%c0_68, %c2, %c0_69, %c0_70] : memref<2x12x32x8xbf16, #tpu.memory_space<vmem>>, vector<1x1x32x8xbf16>
    %99 = vector.shape_cast %98 : vector<1x1x32x8xbf16> to vector<32x8xbf16>
    %c0_71 = arith.constant 0 : index
    %c2_72 = arith.constant 2 : index
    %c0_73 = arith.constant 0 : index
    %100 = vector.load %arg4[%c0_71, %c2_72, %c0_73] : memref<2x12x8xf32, #tpu.memory_space<vmem>>, vector<1x1x8xf32>
    %101 = vector.shape_cast %100 : vector<1x1x8xf32> to vector<1x8xf32>
    %cst_74 = arith.constant dense<0.000000e+00> : vector<8x8xf32>
    %102 = tpu.matmul %4, %99, %cst_74 {dimension_numbers = #tpu.dot_dimension_numbers<[1], [0], [0], [1], [0, 0, 1, 1], [], []>} : vector<8x32xbf16>, vector<32x8xbf16>, vector<8x8xf32> -> vector<8x8xf32>
    %103 = vector.broadcast %101 : vector<1x8xf32> to vector<8x8xf32>
    %104 = arith.addf %102, %103 : vector<8x8xf32>
    %c0_75 = arith.constant 0 : index
    %c6 = arith.constant 6 : index
    %c0_76 = arith.constant 0 : index
    %c0_77 = arith.constant 0 : index
    %105 = vector.load %arg3[%c0_75, %c6, %c0_76, %c0_77] : memref<2x12x32x8xbf16, #tpu.memory_space<vmem>>, vector<1x1x32x8xbf16>
    %106 = vector.shape_cast %105 : vector<1x1x32x8xbf16> to vector<32x8xbf16>
    %c0_78 = arith.constant 0 : index
    %c6_79 = arith.constant 6 : index
    %c0_80 = arith.constant 0 : index
    %107 = vector.load %arg4[%c0_78, %c6_79, %c0_80] : memref<2x12x8xf32, #tpu.memory_space<vmem>>, vector<1x1x8xf32>
    %108 = vector.shape_cast %107 : vector<1x1x8xf32> to vector<1x8xf32>
    %cst_81 = arith.constant dense<0.000000e+00> : vector<8x8xf32>
    %109 = tpu.matmul %4, %106, %cst_81 {dimension_numbers = #tpu.dot_dimension_numbers<[1], [0], [0], [1], [0, 0, 1, 1], [], []>} : vector<8x32xbf16>, vector<32x8xbf16>, vector<8x8xf32> -> vector<8x8xf32>
    %110 = vector.broadcast %108 : vector<1x8xf32> to vector<8x8xf32>
    %111 = arith.addf %109, %110 : vector<8x8xf32>
    %c0_82 = arith.constant 0 : index
    %c10 = arith.constant 10 : index
    %c0_83 = arith.constant 0 : index
    %c0_84 = arith.constant 0 : index
    %112 = vector.load %arg3[%c0_82, %c10, %c0_83, %c0_84] : memref<2x12x32x8xbf16, #tpu.memory_space<vmem>>, vector<1x1x32x8xbf16>
    %113 = vector.shape_cast %112 : vector<1x1x32x8xbf16> to vector<32x8xbf16>
    %c0_85 = arith.constant 0 : index
    %c10_86 = arith.constant 10 : index
    %c0_87 = arith.constant 0 : index
    %114 = vector.load %arg4[%c0_85, %c10_86, %c0_87] : memref<2x12x8xf32, #tpu.memory_space<vmem>>, vector<1x1x8xf32>
    %115 = vector.shape_cast %114 : vector<1x1x8xf32> to vector<1x8xf32>
    %cst_88 = arith.constant dense<0.000000e+00> : vector<8x8xf32>
    %116 = tpu.matmul %4, %113, %cst_88 {dimension_numbers = #tpu.dot_dimension_numbers<[1], [0], [0], [1], [0, 0, 1, 1], [], []>} : vector<8x32xbf16>, vector<32x8xbf16>, vector<8x8xf32> -> vector<8x8xf32>
    %117 = vector.broadcast %115 : vector<1x8xf32> to vector<8x8xf32>
    %118 = arith.addf %116, %117 : vector<8x8xf32>
    %119 = arith.truncf %104 : vector<8x8xf32> to vector<8x8xbf16>
    %120 = arith.truncf %111 : vector<8x8xf32> to vector<8x8xbf16>
    "tpu.trace_start"() <{level = 10 : i32, message = "qd,kd->qk"}> : () -> ()
    %cst_89 = arith.constant dense<0.000000e+00> : vector<8x8xf32>
    %121 = tpu.matmul %119, %120, %cst_89 {dimension_numbers = #tpu.dot_dimension_numbers<[1], [1], [0], [0], [0, 0, 1, 0], [], []>} : vector<8x8xbf16>, vector<8x8xbf16>, vector<8x8xf32> -> vector<8x8xf32>
    "tpu.trace_stop"() : () -> ()
    %cst_90 = arith.constant 0.353553385 : f32
    %122 = vector.broadcast %cst_90 : f32 to vector<8x8xf32>
    %123 = arith.mulf %121, %122 : vector<8x8xf32>
    %124 = vector.broadcast %3 : vector<1x8xf32> to vector<8x8xf32>
    %125 = arith.addf %123, %124 : vector<8x8xf32>
    %cst_91 = arith.constant dense<0xFF800000> : vector<8xf32>
    %126 = vector.multi_reduction <maximumf>, %125, %cst_91 [1] : vector<8x8xf32> to vector<8xf32>
    %127 = vector.shape_cast %126 : vector<8xf32> to vector<8x1xf32>
    %128 = vector.broadcast %127 : vector<8x1xf32> to vector<8x8xf32>
    %129 = arith.subf %125, %128 : vector<8x8xf32>
    %130 = math.exp %129 : vector<8x8xf32>
    %cst_92 = arith.constant dense<0.000000e+00> : vector<8xf32>
    %131 = vector.multi_reduction <add>, %130, %cst_92 [1] : vector<8x8xf32> to vector<8xf32>
    %132 = vector.shape_cast %131 : vector<8xf32> to vector<8x1xf32>
    %133 = tpu.reciprocal %132 {approx = true} : vector<8x1xf32> -> vector<8x1xf32>
    %134 = vector.broadcast %133 : vector<8x1xf32> to vector<8x8xf32>
    %135 = arith.mulf %130, %134 : vector<8x8xf32>
    %136 = arith.truncf %135 : vector<8x8xf32> to vector<8x8xbf16>
    %137 = arith.truncf %118 : vector<8x8xf32> to vector<8x8xbf16>
    %cst_93 = arith.constant dense<0.000000e+00> : vector<8x8xf32>
    %138 = tpu.matmul %136, %137, %cst_93 {dimension_numbers = #tpu.dot_dimension_numbers<[1], [0], [0], [1], [0, 0, 1, 1], [], []>} : vector<8x8xbf16>, vector<8x8xbf16>, vector<8x8xf32> -> vector<8x8xf32>
    %139 = arith.truncf %138 : vector<8x8xf32> to vector<8x8xbf16>
    %c0_94 = arith.constant 0 : index
    %c2_95 = arith.constant 2 : index
    %c0_96 = arith.constant 0 : index
    %c0_97 = arith.constant 0 : index
    %140 = vector.load %arg5[%c0_94, %c2_95, %c0_96, %c0_97] : memref<2x4x8x32xbf16, #tpu.memory_space<vmem>>, vector<1x1x8x32xbf16>
    %141 = vector.shape_cast %140 : vector<1x1x8x32xbf16> to vector<8x32xbf16>
    %cst_98 = arith.constant dense<0.000000e+00> : vector<8x32xf32>
    %142 = tpu.matmul %139, %141, %cst_98 {dimension_numbers = #tpu.dot_dimension_numbers<[1], [0], [0], [1], [0, 0, 1, 1], [], []>} : vector<8x8xbf16>, vector<8x32xbf16>, vector<8x32xf32> -> vector<8x32xf32>
    %143 = arith.addf %97, %142 : vector<8x32xf32>
    %c0_99 = arith.constant 0 : index
    %c3 = arith.constant 3 : index
    %c0_100 = arith.constant 0 : index
    %c0_101 = arith.constant 0 : index
    %144 = vector.load %arg3[%c0_99, %c3, %c0_100, %c0_101] : memref<2x12x32x8xbf16, #tpu.memory_space<vmem>>, vector<1x1x32x8xbf16>
    %145 = vector.shape_cast %144 : vector<1x1x32x8xbf16> to vector<32x8xbf16>
    %c0_102 = arith.constant 0 : index
    %c3_103 = arith.constant 3 : index
    %c0_104 = arith.constant 0 : index
    %146 = vector.load %arg4[%c0_102, %c3_103, %c0_104] : memref<2x12x8xf32, #tpu.memory_space<vmem>>, vector<1x1x8xf32>
    %147 = vector.shape_cast %146 : vector<1x1x8xf32> to vector<1x8xf32>
    %cst_105 = arith.constant dense<0.000000e+00> : vector<8x8xf32>
    %148 = tpu.matmul %4, %145, %cst_105 {dimension_numbers = #tpu.dot_dimension_numbers<[1], [0], [0], [1], [0, 0, 1, 1], [], []>} : vector<8x32xbf16>, vector<32x8xbf16>, vector<8x8xf32> -> vector<8x8xf32>
    %149 = vector.broadcast %147 : vector<1x8xf32> to vector<8x8xf32>
    %150 = arith.addf %148, %149 : vector<8x8xf32>
    %c0_106 = arith.constant 0 : index
    %c7 = arith.constant 7 : index
    %c0_107 = arith.constant 0 : index
    %c0_108 = arith.constant 0 : index
    %151 = vector.load %arg3[%c0_106, %c7, %c0_107, %c0_108] : memref<2x12x32x8xbf16, #tpu.memory_space<vmem>>, vector<1x1x32x8xbf16>
    %152 = vector.shape_cast %151 : vector<1x1x32x8xbf16> to vector<32x8xbf16>
    %c0_109 = arith.constant 0 : index
    %c7_110 = arith.constant 7 : index
    %c0_111 = arith.constant 0 : index
    %153 = vector.load %arg4[%c0_109, %c7_110, %c0_111] : memref<2x12x8xf32, #tpu.memory_space<vmem>>, vector<1x1x8xf32>
    %154 = vector.shape_cast %153 : vector<1x1x8xf32> to vector<1x8xf32>
    %cst_112 = arith.constant dense<0.000000e+00> : vector<8x8xf32>
    %155 = tpu.matmul %4, %152, %cst_112 {dimension_numbers = #tpu.dot_dimension_numbers<[1], [0], [0], [1], [0, 0, 1, 1], [], []>} : vector<8x32xbf16>, vector<32x8xbf16>, vector<8x8xf32> -> vector<8x8xf32>
    %156 = vector.broadcast %154 : vector<1x8xf32> to vector<8x8xf32>
    %157 = arith.addf %155, %156 : vector<8x8xf32>
    %c0_113 = arith.constant 0 : index
    %c11 = arith.constant 11 : index
    %c0_114 = arith.constant 0 : index
    %c0_115 = arith.constant 0 : index
    %158 = vector.load %arg3[%c0_113, %c11, %c0_114, %c0_115] : memref<2x12x32x8xbf16, #tpu.memory_space<vmem>>, vector<1x1x32x8xbf16>
    %159 = vector.shape_cast %158 : vector<1x1x32x8xbf16> to vector<32x8xbf16>
    %c0_116 = arith.constant 0 : index
    %c11_117 = arith.constant 11 : index
    %c0_118 = arith.constant 0 : index
    %160 = vector.load %arg4[%c0_116, %c11_117, %c0_118] : memref<2x12x8xf32, #tpu.memory_space<vmem>>, vector<1x1x8xf32>
    %161 = vector.shape_cast %160 : vector<1x1x8xf32> to vector<1x8xf32>
    %cst_119 = arith.constant dense<0.000000e+00> : vector<8x8xf32>
    %162 = tpu.matmul %4, %159, %cst_119 {dimension_numbers = #tpu.dot_dimension_numbers<[1], [0], [0], [1], [0, 0, 1, 1], [], []>} : vector<8x32xbf16>, vector<32x8xbf16>, vector<8x8xf32> -> vector<8x8xf32>
    %163 = vector.broadcast %161 : vector<1x8xf32> to vector<8x8xf32>
    %164 = arith.addf %162, %163 : vector<8x8xf32>
    %165 = arith.truncf %150 : vector<8x8xf32> to vector<8x8xbf16>
    %166 = arith.truncf %157 : vector<8x8xf32> to vector<8x8xbf16>
    "tpu.trace_start"() <{level = 10 : i32, message = "qd,kd->qk"}> : () -> ()
    %cst_120 = arith.constant dense<0.000000e+00> : vector<8x8xf32>
    %167 = tpu.matmul %165, %166, %cst_120 {dimension_numbers = #tpu.dot_dimension_numbers<[1], [1], [0], [0], [0, 0, 1, 0], [], []>} : vector<8x8xbf16>, vector<8x8xbf16>, vector<8x8xf32> -> vector<8x8xf32>
    "tpu.trace_stop"() : () -> ()
    %cst_121 = arith.constant 0.353553385 : f32
    %168 = vector.broadcast %cst_121 : f32 to vector<8x8xf32>
    %169 = arith.mulf %167, %168 : vector<8x8xf32>
    %170 = vector.broadcast %3 : vector<1x8xf32> to vector<8x8xf32>
    %171 = arith.addf %169, %170 : vector<8x8xf32>
    %cst_122 = arith.constant dense<0xFF800000> : vector<8xf32>
    %172 = vector.multi_reduction <maximumf>, %171, %cst_122 [1] : vector<8x8xf32> to vector<8xf32>
    %173 = vector.shape_cast %172 : vector<8xf32> to vector<8x1xf32>
    %174 = vector.broadcast %173 : vector<8x1xf32> to vector<8x8xf32>
    %175 = arith.subf %171, %174 : vector<8x8xf32>
    %176 = math.exp %175 : vector<8x8xf32>
    %cst_123 = arith.constant dense<0.000000e+00> : vector<8xf32>
    %177 = vector.multi_reduction <add>, %176, %cst_123 [1] : vector<8x8xf32> to vector<8xf32>
    %178 = vector.shape_cast %177 : vector<8xf32> to vector<8x1xf32>
    %179 = tpu.reciprocal %178 {approx = true} : vector<8x1xf32> -> vector<8x1xf32>
    %180 = vector.broadcast %179 : vector<8x1xf32> to vector<8x8xf32>
    %181 = arith.mulf %176, %180 : vector<8x8xf32>
    %182 = arith.truncf %181 : vector<8x8xf32> to vector<8x8xbf16>
    %183 = arith.truncf %164 : vector<8x8xf32> to vector<8x8xbf16>
    %cst_124 = arith.constant dense<0.000000e+00> : vector<8x8xf32>
    %184 = tpu.matmul %182, %183, %cst_124 {dimension_numbers = #tpu.dot_dimension_numbers<[1], [0], [0], [1], [0, 0, 1, 1], [], []>} : vector<8x8xbf16>, vector<8x8xbf16>, vector<8x8xf32> -> vector<8x8xf32>
    %185 = arith.truncf %184 : vector<8x8xf32> to vector<8x8xbf16>
    %c0_125 = arith.constant 0 : index
    %c3_126 = arith.constant 3 : index
    %c0_127 = arith.constant 0 : index
    %c0_128 = arith.constant 0 : index
    %186 = vector.load %arg5[%c0_125, %c3_126, %c0_127, %c0_128] : memref<2x4x8x32xbf16, #tpu.memory_space<vmem>>, vector<1x1x8x32xbf16>
    %187 = vector.shape_cast %186 : vector<1x1x8x32xbf16> to vector<8x32xbf16>
    %cst_129 = arith.constant dense<0.000000e+00> : vector<8x32xf32>
    %188 = tpu.matmul %185, %187, %cst_129 {dimension_numbers = #tpu.dot_dimension_numbers<[1], [0], [0], [1], [0, 0, 1, 1], [], []>} : vector<8x8xbf16>, vector<8x32xbf16>, vector<8x32xf32> -> vector<8x32xf32>
    %189 = arith.addf %143, %188 : vector<8x32xf32>
    %c0_130 = arith.constant 0 : index
    %c0_131 = arith.constant 0 : index
    %c0_132 = arith.constant 0 : index
    %190 = vector.load %arg9[%c0_130, %c0_131, %c0_132] : memref<2x6x32xf32, #tpu.memory_space<vmem>>, vector<1x1x32xf32>
    %191 = vector.shape_cast %190 : vector<1x1x32xf32> to vector<1x32xf32>
    %192 = vector.broadcast %191 : vector<1x32xf32> to vector<8x32xf32>
    %193 = arith.addf %189, %192 : vector<8x32xf32>
    %194 = arith.addf %1, %193 : vector<8x32xf32>
    %c0_133 = arith.constant 0 : index
    %c1_134 = arith.constant 1 : index
    %c0_135 = arith.constant 0 : index
    %195 = vector.load %arg9[%c0_133, %c1_134, %c0_135] : memref<2x6x32xf32, #tpu.memory_space<vmem>>, vector<1x1x32xf32>
    %196 = vector.shape_cast %195 : vector<1x1x32xf32> to vector<1x32xf32>
    %c0_136 = arith.constant 0 : index
    %c2_137 = arith.constant 2 : index
    %c0_138 = arith.constant 0 : index
    %197 = vector.load %arg9[%c0_136, %c2_137, %c0_138] : memref<2x6x32xf32, #tpu.memory_space<vmem>>, vector<1x1x32xf32>
    %198 = vector.shape_cast %197 : vector<1x1x32xf32> to vector<1x32xf32>
    %cst_139 = arith.constant dense<0.000000e+00> : vector<8xf32>
    %199 = vector.multi_reduction <add>, %194, %cst_139 [1] : vector<8x32xf32> to vector<8xf32>
    %200 = vector.shape_cast %199 : vector<8xf32> to vector<8x1xf32>
    %cst_140 = arith.constant 3.200000e+01 : f32
    %201 = vector.broadcast %cst_140 : f32 to vector<8x1xf32>
    %202 = arith.divf %200, %201 : vector<8x1xf32>
    %203 = vector.broadcast %202 : vector<8x1xf32> to vector<8x32xf32>
    %204 = arith.subf %194, %203 : vector<8x32xf32>
    %205 = arith.mulf %204, %204 : vector<8x32xf32>
    %cst_141 = arith.constant dense<0.000000e+00> : vector<8xf32>
    %206 = vector.multi_reduction <add>, %205, %cst_141 [1] : vector<8x32xf32> to vector<8xf32>
    %207 = vector.shape_cast %206 : vector<8xf32> to vector<8x1xf32>
    %cst_142 = arith.constant 3.200000e+01 : f32
    %208 = vector.broadcast %cst_142 : f32 to vector<8x1xf32>
    %209 = arith.divf %207, %208 : vector<8x1xf32>
    %210 = vector.broadcast %202 : vector<8x1xf32> to vector<8x32xf32>
    %211 = arith.subf %194, %210 : vector<8x32xf32>
    %cst_143 = arith.constant 9.99999974E-6 : f32
    %212 = vector.broadcast %cst_143 : f32 to vector<8x1xf32>
    %213 = arith.addf %209, %212 : vector<8x1xf32>
    %214 = math.rsqrt %213 : vector<8x1xf32>
    %215 = vector.broadcast %214 : vector<8x1xf32> to vector<8x32xf32>
    %216 = arith.mulf %211, %215 : vector<8x32xf32>
    %217 = vector.broadcast %196 : vector<1x32xf32> to vector<8x32xf32>
    %218 = arith.mulf %216, %217 : vector<8x32xf32>
    %219 = vector.broadcast %198 : vector<1x32xf32> to vector<8x32xf32>
    %220 = arith.addf %218, %219 : vector<8x32xf32>
    %221 = arith.truncf %220 : vector<8x32xf32> to vector<8x32xbf16>
    %c0_144 = arith.constant 0 : index
    %c0_145 = arith.constant 0 : index
    %c0_146 = arith.constant 0 : index
    %222 = vector.load %arg6[%c0_144, %c0_145, %c0_146] : memref<2x32x64xbf16, #tpu.memory_space<vmem>>, vector<1x32x64xbf16>
    %223 = vector.shape_cast %222 : vector<1x32x64xbf16> to vector<32x64xbf16>
    %cst_147 = arith.constant dense<0.000000e+00> : vector<8x64xf32>
    %224 = tpu.matmul %221, %223, %cst_147 {dimension_numbers = #tpu.dot_dimension_numbers<[1], [0], [0], [1], [0, 0, 1, 1], [], []>} : vector<8x32xbf16>, vector<32x64xbf16>, vector<8x64xf32> -> vector<8x64xf32>
    %c0_148 = arith.constant 0 : index
    %c0_149 = arith.constant 0 : index
    %c0_150 = arith.constant 0 : index
    %225 = vector.load %arg7[%c0_148, %c0_149, %c0_150] : memref<2x1x64xf32, #tpu.memory_space<vmem>>, vector<1x1x64xf32>
    %226 = vector.shape_cast %225 : vector<1x1x64xf32> to vector<1x64xf32>
    %227 = vector.broadcast %226 : vector<1x64xf32> to vector<8x64xf32>
    %228 = arith.addf %224, %227 : vector<8x64xf32>
    %cst_151 = arith.constant 5.000000e-01 : f32
    %229 = vector.broadcast %cst_151 : f32 to vector<8x64xf32>
    %230 = arith.mulf %229, %228 : vector<8x64xf32>
    %cst_152 = arith.constant 4.471500e-02 : f32
    %231 = vector.broadcast %cst_152 : f32 to vector<8x64xf32>
    %232 = arith.mulf %231, %228 : vector<8x64xf32>
    %233 = arith.mulf %232, %228 : vector<8x64xf32>
    %234 = arith.mulf %233, %228 : vector<8x64xf32>
    %235 = arith.addf %228, %234 : vector<8x64xf32>
    %cst_153 = arith.constant 0.797884583 : f32
    %236 = vector.broadcast %cst_153 : f32 to vector<8x64xf32>
    %237 = arith.mulf %236, %235 : vector<8x64xf32>
    %238 = math.tanh %237 : vector<8x64xf32>
    %cst_154 = arith.constant 1.000000e+00 : f32
    %239 = vector.broadcast %cst_154 : f32 to vector<8x64xf32>
    %240 = arith.addf %239, %238 : vector<8x64xf32>
    %241 = arith.mulf %230, %240 : vector<8x64xf32>
    %242 = arith.truncf %241 : vector<8x64xf32> to vector<8x64xbf16>
    %c0_155 = arith.constant 0 : index
    %c0_156 = arith.constant 0 : index
    %c0_157 = arith.constant 0 : index
    %243 = vector.load %arg8[%c0_155, %c0_156, %c0_157] : memref<2x64x32xbf16, #tpu.memory_space<vmem>>, vector<1x64x32xbf16>
    %244 = vector.shape_cast %243 : vector<1x64x32xbf16> to vector<64x32xbf16>
    %cst_158 = arith.constant dense<0.000000e+00> : vector<8x32xf32>
    %245 = tpu.matmul %242, %244, %cst_158 {dimension_numbers = #tpu.dot_dimension_numbers<[1], [0], [0], [1], [0, 0, 1, 1], [], []>} : vector<8x64xbf16>, vector<64x32xbf16>, vector<8x32xf32> -> vector<8x32xf32>
    %c0_159 = arith.constant 0 : index
    %c3_160 = arith.constant 3 : index
    %c0_161 = arith.constant 0 : index
    %246 = vector.load %arg9[%c0_159, %c3_160, %c0_161] : memref<2x6x32xf32, #tpu.memory_space<vmem>>, vector<1x1x32xf32>
    %247 = vector.shape_cast %246 : vector<1x1x32xf32> to vector<1x32xf32>
    %248 = vector.broadcast %247 : vector<1x32xf32> to vector<8x32xf32>
    %249 = arith.addf %245, %248 : vector<8x32xf32>
    %250 = arith.addf %220, %249 : vector<8x32xf32>
    %c0_162 = arith.constant 0 : index
    %c4_163 = arith.constant 4 : index
    %c0_164 = arith.constant 0 : index
    %251 = vector.load %arg9[%c0_162, %c4_163, %c0_164] : memref<2x6x32xf32, #tpu.memory_space<vmem>>, vector<1x1x32xf32>
    %252 = vector.shape_cast %251 : vector<1x1x32xf32> to vector<1x32xf32>
    %c0_165 = arith.constant 0 : index
    %c5_166 = arith.constant 5 : index
    %c0_167 = arith.constant 0 : index
    %253 = vector.load %arg9[%c0_165, %c5_166, %c0_167] : memref<2x6x32xf32, #tpu.memory_space<vmem>>, vector<1x1x32xf32>
    %254 = vector.shape_cast %253 : vector<1x1x32xf32> to vector<1x32xf32>
    %cst_168 = arith.constant dense<0.000000e+00> : vector<8xf32>
    %255 = vector.multi_reduction <add>, %250, %cst_168 [1] : vector<8x32xf32> to vector<8xf32>
    %256 = vector.shape_cast %255 : vector<8xf32> to vector<8x1xf32>
    %cst_169 = arith.constant 3.200000e+01 : f32
    %257 = vector.broadcast %cst_169 : f32 to vector<8x1xf32>
    %258 = arith.divf %256, %257 : vector<8x1xf32>
    %259 = vector.broadcast %258 : vector<8x1xf32> to vector<8x32xf32>
    %260 = arith.subf %250, %259 : vector<8x32xf32>
    %261 = arith.mulf %260, %260 : vector<8x32xf32>
    %cst_170 = arith.constant dense<0.000000e+00> : vector<8xf32>
    %262 = vector.multi_reduction <add>, %261, %cst_170 [1] : vector<8x32xf32> to vector<8xf32>
    %263 = vector.shape_cast %262 : vector<8xf32> to vector<8x1xf32>
    %cst_171 = arith.constant 3.200000e+01 : f32
    %264 = vector.broadcast %cst_171 : f32 to vector<8x1xf32>
    %265 = arith.divf %263, %264 : vector<8x1xf32>
    %266 = vector.broadcast %258 : vector<8x1xf32> to vector<8x32xf32>
    %267 = arith.subf %250, %266 : vector<8x32xf32>
    %cst_172 = arith.constant 9.99999974E-6 : f32
    %268 = vector.broadcast %cst_172 : f32 to vector<8x1xf32>
    %269 = arith.addf %265, %268 : vector<8x1xf32>
    %270 = math.rsqrt %269 : vector<8x1xf32>
    %271 = vector.broadcast %270 : vector<8x1xf32> to vector<8x32xf32>
    %272 = arith.mulf %267, %271 : vector<8x32xf32>
    %273 = vector.broadcast %252 : vector<1x32xf32> to vector<8x32xf32>
    %274 = arith.mulf %272, %273 : vector<8x32xf32>
    %275 = vector.broadcast %254 : vector<1x32xf32> to vector<8x32xf32>
    %276 = arith.addf %274, %275 : vector<8x32xf32>
    %277 = arith.truncf %276 : vector<8x32xf32> to vector<8x32xbf16>
    %cst_173 = arith.constant 0.000000e+00 : f32
    %278 = vector.broadcast %cst_173 : f32 to vector<8x32xf32>
    %c1_174 = arith.constant 1 : index
    %c0_175 = arith.constant 0 : index
    %c0_176 = arith.constant 0 : index
    %c0_177 = arith.constant 0 : index
    %279 = vector.load %arg3[%c1_174, %c0_175, %c0_176, %c0_177] : memref<2x12x32x8xbf16, #tpu.memory_space<vmem>>, vector<1x1x32x8xbf16>
    %280 = vector.shape_cast %279 : vector<1x1x32x8xbf16> to vector<32x8xbf16>
    %c1_178 = arith.constant 1 : index
    %c0_179 = arith.constant 0 : index
    %c0_180 = arith.constant 0 : index
    %281 = vector.load %arg4[%c1_178, %c0_179, %c0_180] : memref<2x12x8xf32, #tpu.memory_space<vmem>>, vector<1x1x8xf32>
    %282 = vector.shape_cast %281 : vector<1x1x8xf32> to vector<1x8xf32>
    %cst_181 = arith.constant dense<0.000000e+00> : vector<8x8xf32>
    %283 = tpu.matmul %277, %280, %cst_181 {dimension_numbers = #tpu.dot_dimension_numbers<[1], [0], [0], [1], [0, 0, 1, 1], [], []>} : vector<8x32xbf16>, vector<32x8xbf16>, vector<8x8xf32> -> vector<8x8xf32>
    %284 = vector.broadcast %282 : vector<1x8xf32> to vector<8x8xf32>
    %285 = arith.addf %283, %284 : vector<8x8xf32>
    %c1_182 = arith.constant 1 : index
    %c4_183 = arith.constant 4 : index
    %c0_184 = arith.constant 0 : index
    %c0_185 = arith.constant 0 : index
    %286 = vector.load %arg3[%c1_182, %c4_183, %c0_184, %c0_185] : memref<2x12x32x8xbf16, #tpu.memory_space<vmem>>, vector<1x1x32x8xbf16>
    %287 = vector.shape_cast %286 : vector<1x1x32x8xbf16> to vector<32x8xbf16>
    %c1_186 = arith.constant 1 : index
    %c4_187 = arith.constant 4 : index
    %c0_188 = arith.constant 0 : index
    %288 = vector.load %arg4[%c1_186, %c4_187, %c0_188] : memref<2x12x8xf32, #tpu.memory_space<vmem>>, vector<1x1x8xf32>
    %289 = vector.shape_cast %288 : vector<1x1x8xf32> to vector<1x8xf32>
    %cst_189 = arith.constant dense<0.000000e+00> : vector<8x8xf32>
    %290 = tpu.matmul %277, %287, %cst_189 {dimension_numbers = #tpu.dot_dimension_numbers<[1], [0], [0], [1], [0, 0, 1, 1], [], []>} : vector<8x32xbf16>, vector<32x8xbf16>, vector<8x8xf32> -> vector<8x8xf32>
    %291 = vector.broadcast %289 : vector<1x8xf32> to vector<8x8xf32>
    %292 = arith.addf %290, %291 : vector<8x8xf32>
    %c1_190 = arith.constant 1 : index
    %c8_191 = arith.constant 8 : index
    %c0_192 = arith.constant 0 : index
    %c0_193 = arith.constant 0 : index
    %293 = vector.load %arg3[%c1_190, %c8_191, %c0_192, %c0_193] : memref<2x12x32x8xbf16, #tpu.memory_space<vmem>>, vector<1x1x32x8xbf16>
    %294 = vector.shape_cast %293 : vector<1x1x32x8xbf16> to vector<32x8xbf16>
    %c1_194 = arith.constant 1 : index
    %c8_195 = arith.constant 8 : index
    %c0_196 = arith.constant 0 : index
    %295 = vector.load %arg4[%c1_194, %c8_195, %c0_196] : memref<2x12x8xf32, #tpu.memory_space<vmem>>, vector<1x1x8xf32>
    %296 = vector.shape_cast %295 : vector<1x1x8xf32> to vector<1x8xf32>
    %cst_197 = arith.constant dense<0.000000e+00> : vector<8x8xf32>
    %297 = tpu.matmul %277, %294, %cst_197 {dimension_numbers = #tpu.dot_dimension_numbers<[1], [0], [0], [1], [0, 0, 1, 1], [], []>} : vector<8x32xbf16>, vector<32x8xbf16>, vector<8x8xf32> -> vector<8x8xf32>
    %298 = vector.broadcast %296 : vector<1x8xf32> to vector<8x8xf32>
    %299 = arith.addf %297, %298 : vector<8x8xf32>
    %300 = arith.truncf %285 : vector<8x8xf32> to vector<8x8xbf16>
    %301 = arith.truncf %292 : vector<8x8xf32> to vector<8x8xbf16>
    "tpu.trace_start"() <{level = 10 : i32, message = "qd,kd->qk"}> : () -> ()
    %cst_198 = arith.constant dense<0.000000e+00> : vector<8x8xf32>
    %302 = tpu.matmul %300, %301, %cst_198 {dimension_numbers = #tpu.dot_dimension_numbers<[1], [1], [0], [0], [0, 0, 1, 0], [], []>} : vector<8x8xbf16>, vector<8x8xbf16>, vector<8x8xf32> -> vector<8x8xf32>
    "tpu.trace_stop"() : () -> ()
    %cst_199 = arith.constant 0.353553385 : f32
    %303 = vector.broadcast %cst_199 : f32 to vector<8x8xf32>
    %304 = arith.mulf %302, %303 : vector<8x8xf32>
    %305 = vector.broadcast %3 : vector<1x8xf32> to vector<8x8xf32>
    %306 = arith.addf %304, %305 : vector<8x8xf32>
    %cst_200 = arith.constant dense<0xFF800000> : vector<8xf32>
    %307 = vector.multi_reduction <maximumf>, %306, %cst_200 [1] : vector<8x8xf32> to vector<8xf32>
    %308 = vector.shape_cast %307 : vector<8xf32> to vector<8x1xf32>
    %309 = vector.broadcast %308 : vector<8x1xf32> to vector<8x8xf32>
    %310 = arith.subf %306, %309 : vector<8x8xf32>
    %311 = math.exp %310 : vector<8x8xf32>
    %cst_201 = arith.constant dense<0.000000e+00> : vector<8xf32>
    %312 = vector.multi_reduction <add>, %311, %cst_201 [1] : vector<8x8xf32> to vector<8xf32>
    %313 = vector.shape_cast %312 : vector<8xf32> to vector<8x1xf32>
    %314 = tpu.reciprocal %313 {approx = true} : vector<8x1xf32> -> vector<8x1xf32>
    %315 = vector.broadcast %314 : vector<8x1xf32> to vector<8x8xf32>
    %316 = arith.mulf %311, %315 : vector<8x8xf32>
    %317 = arith.truncf %316 : vector<8x8xf32> to vector<8x8xbf16>
    %318 = arith.truncf %299 : vector<8x8xf32> to vector<8x8xbf16>
    %cst_202 = arith.constant dense<0.000000e+00> : vector<8x8xf32>
    %319 = tpu.matmul %317, %318, %cst_202 {dimension_numbers = #tpu.dot_dimension_numbers<[1], [0], [0], [1], [0, 0, 1, 1], [], []>} : vector<8x8xbf16>, vector<8x8xbf16>, vector<8x8xf32> -> vector<8x8xf32>
    %320 = arith.truncf %319 : vector<8x8xf32> to vector<8x8xbf16>
    %c1_203 = arith.constant 1 : index
    %c0_204 = arith.constant 0 : index
    %c0_205 = arith.constant 0 : index
    %c0_206 = arith.constant 0 : index
    %321 = vector.load %arg5[%c1_203, %c0_204, %c0_205, %c0_206] : memref<2x4x8x32xbf16, #tpu.memory_space<vmem>>, vector<1x1x8x32xbf16>
    %322 = vector.shape_cast %321 : vector<1x1x8x32xbf16> to vector<8x32xbf16>
    %cst_207 = arith.constant dense<0.000000e+00> : vector<8x32xf32>
    %323 = tpu.matmul %320, %322, %cst_207 {dimension_numbers = #tpu.dot_dimension_numbers<[1], [0], [0], [1], [0, 0, 1, 1], [], []>} : vector<8x8xbf16>, vector<8x32xbf16>, vector<8x32xf32> -> vector<8x32xf32>
    %324 = arith.addf %278, %323 : vector<8x32xf32>
    %c1_208 = arith.constant 1 : index
    %c1_209 = arith.constant 1 : index
    %c0_210 = arith.constant 0 : index
    %c0_211 = arith.constant 0 : index
    %325 = vector.load %arg3[%c1_208, %c1_209, %c0_210, %c0_211] : memref<2x12x32x8xbf16, #tpu.memory_space<vmem>>, vector<1x1x32x8xbf16>
    %326 = vector.shape_cast %325 : vector<1x1x32x8xbf16> to vector<32x8xbf16>
    %c1_212 = arith.constant 1 : index
    %c1_213 = arith.constant 1 : index
    %c0_214 = arith.constant 0 : index
    %327 = vector.load %arg4[%c1_212, %c1_213, %c0_214] : memref<2x12x8xf32, #tpu.memory_space<vmem>>, vector<1x1x8xf32>
    %328 = vector.shape_cast %327 : vector<1x1x8xf32> to vector<1x8xf32>
    %cst_215 = arith.constant dense<0.000000e+00> : vector<8x8xf32>
    %329 = tpu.matmul %277, %326, %cst_215 {dimension_numbers = #tpu.dot_dimension_numbers<[1], [0], [0], [1], [0, 0, 1, 1], [], []>} : vector<8x32xbf16>, vector<32x8xbf16>, vector<8x8xf32> -> vector<8x8xf32>
    %330 = vector.broadcast %328 : vector<1x8xf32> to vector<8x8xf32>
    %331 = arith.addf %329, %330 : vector<8x8xf32>
    %c1_216 = arith.constant 1 : index
    %c5_217 = arith.constant 5 : index
    %c0_218 = arith.constant 0 : index
    %c0_219 = arith.constant 0 : index
    %332 = vector.load %arg3[%c1_216, %c5_217, %c0_218, %c0_219] : memref<2x12x32x8xbf16, #tpu.memory_space<vmem>>, vector<1x1x32x8xbf16>
    %333 = vector.shape_cast %332 : vector<1x1x32x8xbf16> to vector<32x8xbf16>
    %c1_220 = arith.constant 1 : index
    %c5_221 = arith.constant 5 : index
    %c0_222 = arith.constant 0 : index
    %334 = vector.load %arg4[%c1_220, %c5_221, %c0_222] : memref<2x12x8xf32, #tpu.memory_space<vmem>>, vector<1x1x8xf32>
    %335 = vector.shape_cast %334 : vector<1x1x8xf32> to vector<1x8xf32>
    %cst_223 = arith.constant dense<0.000000e+00> : vector<8x8xf32>
    %336 = tpu.matmul %277, %333, %cst_223 {dimension_numbers = #tpu.dot_dimension_numbers<[1], [0], [0], [1], [0, 0, 1, 1], [], []>} : vector<8x32xbf16>, vector<32x8xbf16>, vector<8x8xf32> -> vector<8x8xf32>
    %337 = vector.broadcast %335 : vector<1x8xf32> to vector<8x8xf32>
    %338 = arith.addf %336, %337 : vector<8x8xf32>
    %c1_224 = arith.constant 1 : index
    %c9_225 = arith.constant 9 : index
    %c0_226 = arith.constant 0 : index
    %c0_227 = arith.constant 0 : index
    %339 = vector.load %arg3[%c1_224, %c9_225, %c0_226, %c0_227] : memref<2x12x32x8xbf16, #tpu.memory_space<vmem>>, vector<1x1x32x8xbf16>
    %340 = vector.shape_cast %339 : vector<1x1x32x8xbf16> to vector<32x8xbf16>
    %c1_228 = arith.constant 1 : index
    %c9_229 = arith.constant 9 : index
    %c0_230 = arith.constant 0 : index
    %341 = vector.load %arg4[%c1_228, %c9_229, %c0_230] : memref<2x12x8xf32, #tpu.memory_space<vmem>>, vector<1x1x8xf32>
    %342 = vector.shape_cast %341 : vector<1x1x8xf32> to vector<1x8xf32>
    %cst_231 = arith.constant dense<0.000000e+00> : vector<8x8xf32>
    %343 = tpu.matmul %277, %340, %cst_231 {dimension_numbers = #tpu.dot_dimension_numbers<[1], [0], [0], [1], [0, 0, 1, 1], [], []>} : vector<8x32xbf16>, vector<32x8xbf16>, vector<8x8xf32> -> vector<8x8xf32>
    %344 = vector.broadcast %342 : vector<1x8xf32> to vector<8x8xf32>
    %345 = arith.addf %343, %344 : vector<8x8xf32>
    %346 = arith.truncf %331 : vector<8x8xf32> to vector<8x8xbf16>
    %347 = arith.truncf %338 : vector<8x8xf32> to vector<8x8xbf16>
    "tpu.trace_start"() <{level = 10 : i32, message = "qd,kd->qk"}> : () -> ()
    %cst_232 = arith.constant dense<0.000000e+00> : vector<8x8xf32>
    %348 = tpu.matmul %346, %347, %cst_232 {dimension_numbers = #tpu.dot_dimension_numbers<[1], [1], [0], [0], [0, 0, 1, 0], [], []>} : vector<8x8xbf16>, vector<8x8xbf16>, vector<8x8xf32> -> vector<8x8xf32>
    "tpu.trace_stop"() : () -> ()
    %cst_233 = arith.constant 0.353553385 : f32
    %349 = vector.broadcast %cst_233 : f32 to vector<8x8xf32>
    %350 = arith.mulf %348, %349 : vector<8x8xf32>
    %351 = vector.broadcast %3 : vector<1x8xf32> to vector<8x8xf32>
    %352 = arith.addf %350, %351 : vector<8x8xf32>
    %cst_234 = arith.constant dense<0xFF800000> : vector<8xf32>
    %353 = vector.multi_reduction <maximumf>, %352, %cst_234 [1] : vector<8x8xf32> to vector<8xf32>
    %354 = vector.shape_cast %353 : vector<8xf32> to vector<8x1xf32>
    %355 = vector.broadcast %354 : vector<8x1xf32> to vector<8x8xf32>
    %356 = arith.subf %352, %355 : vector<8x8xf32>
    %357 = math.exp %356 : vector<8x8xf32>
    %cst_235 = arith.constant dense<0.000000e+00> : vector<8xf32>
    %358 = vector.multi_reduction <add>, %357, %cst_235 [1] : vector<8x8xf32> to vector<8xf32>
    %359 = vector.shape_cast %358 : vector<8xf32> to vector<8x1xf32>
    %360 = tpu.reciprocal %359 {approx = true} : vector<8x1xf32> -> vector<8x1xf32>
    %361 = vector.broadcast %360 : vector<8x1xf32> to vector<8x8xf32>
    %362 = arith.mulf %357, %361 : vector<8x8xf32>
    %363 = arith.truncf %362 : vector<8x8xf32> to vector<8x8xbf16>
    %364 = arith.truncf %345 : vector<8x8xf32> to vector<8x8xbf16>
    %cst_236 = arith.constant dense<0.000000e+00> : vector<8x8xf32>
    %365 = tpu.matmul %363, %364, %cst_236 {dimension_numbers = #tpu.dot_dimension_numbers<[1], [0], [0], [1], [0, 0, 1, 1], [], []>} : vector<8x8xbf16>, vector<8x8xbf16>, vector<8x8xf32> -> vector<8x8xf32>
    %366 = arith.truncf %365 : vector<8x8xf32> to vector<8x8xbf16>
    %c1_237 = arith.constant 1 : index
    %c1_238 = arith.constant 1 : index
    %c0_239 = arith.constant 0 : index
    %c0_240 = arith.constant 0 : index
    %367 = vector.load %arg5[%c1_237, %c1_238, %c0_239, %c0_240] : memref<2x4x8x32xbf16, #tpu.memory_space<vmem>>, vector<1x1x8x32xbf16>
    %368 = vector.shape_cast %367 : vector<1x1x8x32xbf16> to vector<8x32xbf16>
    %cst_241 = arith.constant dense<0.000000e+00> : vector<8x32xf32>
    %369 = tpu.matmul %366, %368, %cst_241 {dimension_numbers = #tpu.dot_dimension_numbers<[1], [0], [0], [1], [0, 0, 1, 1], [], []>} : vector<8x8xbf16>, vector<8x32xbf16>, vector<8x32xf32> -> vector<8x32xf32>
    %370 = arith.addf %324, %369 : vector<8x32xf32>
    %c1_242 = arith.constant 1 : index
    %c2_243 = arith.constant 2 : index
    %c0_244 = arith.constant 0 : index
    %c0_245 = arith.constant 0 : index
    %371 = vector.load %arg3[%c1_242, %c2_243, %c0_244, %c0_245] : memref<2x12x32x8xbf16, #tpu.memory_space<vmem>>, vector<1x1x32x8xbf16>
    %372 = vector.shape_cast %371 : vector<1x1x32x8xbf16> to vector<32x8xbf16>
    %c1_246 = arith.constant 1 : index
    %c2_247 = arith.constant 2 : index
    %c0_248 = arith.constant 0 : index
    %373 = vector.load %arg4[%c1_246, %c2_247, %c0_248] : memref<2x12x8xf32, #tpu.memory_space<vmem>>, vector<1x1x8xf32>
    %374 = vector.shape_cast %373 : vector<1x1x8xf32> to vector<1x8xf32>
    %cst_249 = arith.constant dense<0.000000e+00> : vector<8x8xf32>
    %375 = tpu.matmul %277, %372, %cst_249 {dimension_numbers = #tpu.dot_dimension_numbers<[1], [0], [0], [1], [0, 0, 1, 1], [], []>} : vector<8x32xbf16>, vector<32x8xbf16>, vector<8x8xf32> -> vector<8x8xf32>
    %376 = vector.broadcast %374 : vector<1x8xf32> to vector<8x8xf32>
    %377 = arith.addf %375, %376 : vector<8x8xf32>
    %c1_250 = arith.constant 1 : index
    %c6_251 = arith.constant 6 : index
    %c0_252 = arith.constant 0 : index
    %c0_253 = arith.constant 0 : index
    %378 = vector.load %arg3[%c1_250, %c6_251, %c0_252, %c0_253] : memref<2x12x32x8xbf16, #tpu.memory_space<vmem>>, vector<1x1x32x8xbf16>
    %379 = vector.shape_cast %378 : vector<1x1x32x8xbf16> to vector<32x8xbf16>
    %c1_254 = arith.constant 1 : index
    %c6_255 = arith.constant 6 : index
    %c0_256 = arith.constant 0 : index
    %380 = vector.load %arg4[%c1_254, %c6_255, %c0_256] : memref<2x12x8xf32, #tpu.memory_space<vmem>>, vector<1x1x8xf32>
    %381 = vector.shape_cast %380 : vector<1x1x8xf32> to vector<1x8xf32>
    %cst_257 = arith.constant dense<0.000000e+00> : vector<8x8xf32>
    %382 = tpu.matmul %277, %379, %cst_257 {dimension_numbers = #tpu.dot_dimension_numbers<[1], [0], [0], [1], [0, 0, 1, 1], [], []>} : vector<8x32xbf16>, vector<32x8xbf16>, vector<8x8xf32> -> vector<8x8xf32>
    %383 = vector.broadcast %381 : vector<1x8xf32> to vector<8x8xf32>
    %384 = arith.addf %382, %383 : vector<8x8xf32>
    %c1_258 = arith.constant 1 : index
    %c10_259 = arith.constant 10 : index
    %c0_260 = arith.constant 0 : index
    %c0_261 = arith.constant 0 : index
    %385 = vector.load %arg3[%c1_258, %c10_259, %c0_260, %c0_261] : memref<2x12x32x8xbf16, #tpu.memory_space<vmem>>, vector<1x1x32x8xbf16>
    %386 = vector.shape_cast %385 : vector<1x1x32x8xbf16> to vector<32x8xbf16>
    %c1_262 = arith.constant 1 : index
    %c10_263 = arith.constant 10 : index
    %c0_264 = arith.constant 0 : index
    %387 = vector.load %arg4[%c1_262, %c10_263, %c0_264] : memref<2x12x8xf32, #tpu.memory_space<vmem>>, vector<1x1x8xf32>
    %388 = vector.shape_cast %387 : vector<1x1x8xf32> to vector<1x8xf32>
    %cst_265 = arith.constant dense<0.000000e+00> : vector<8x8xf32>
    %389 = tpu.matmul %277, %386, %cst_265 {dimension_numbers = #tpu.dot_dimension_numbers<[1], [0], [0], [1], [0, 0, 1, 1], [], []>} : vector<8x32xbf16>, vector<32x8xbf16>, vector<8x8xf32> -> vector<8x8xf32>
    %390 = vector.broadcast %388 : vector<1x8xf32> to vector<8x8xf32>
    %391 = arith.addf %389, %390 : vector<8x8xf32>
    %392 = arith.truncf %377 : vector<8x8xf32> to vector<8x8xbf16>
    %393 = arith.truncf %384 : vector<8x8xf32> to vector<8x8xbf16>
    "tpu.trace_start"() <{level = 10 : i32, message = "qd,kd->qk"}> : () -> ()
    %cst_266 = arith.constant dense<0.000000e+00> : vector<8x8xf32>
    %394 = tpu.matmul %392, %393, %cst_266 {dimension_numbers = #tpu.dot_dimension_numbers<[1], [1], [0], [0], [0, 0, 1, 0], [], []>} : vector<8x8xbf16>, vector<8x8xbf16>, vector<8x8xf32> -> vector<8x8xf32>
    "tpu.trace_stop"() : () -> ()
    %cst_267 = arith.constant 0.353553385 : f32
    %395 = vector.broadcast %cst_267 : f32 to vector<8x8xf32>
    %396 = arith.mulf %394, %395 : vector<8x8xf32>
    %397 = vector.broadcast %3 : vector<1x8xf32> to vector<8x8xf32>
    %398 = arith.addf %396, %397 : vector<8x8xf32>
    %cst_268 = arith.constant dense<0xFF800000> : vector<8xf32>
    %399 = vector.multi_reduction <maximumf>, %398, %cst_268 [1] : vector<8x8xf32> to vector<8xf32>
    %400 = vector.shape_cast %399 : vector<8xf32> to vector<8x1xf32>
    %401 = vector.broadcast %400 : vector<8x1xf32> to vector<8x8xf32>
    %402 = arith.subf %398, %401 : vector<8x8xf32>
    %403 = math.exp %402 : vector<8x8xf32>
    %cst_269 = arith.constant dense<0.000000e+00> : vector<8xf32>
    %404 = vector.multi_reduction <add>, %403, %cst_269 [1] : vector<8x8xf32> to vector<8xf32>
    %405 = vector.shape_cast %404 : vector<8xf32> to vector<8x1xf32>
    %406 = tpu.reciprocal %405 {approx = true} : vector<8x1xf32> -> vector<8x1xf32>
    %407 = vector.broadcast %406 : vector<8x1xf32> to vector<8x8xf32>
    %408 = arith.mulf %403, %407 : vector<8x8xf32>
    %409 = arith.truncf %408 : vector<8x8xf32> to vector<8x8xbf16>
    %410 = arith.truncf %391 : vector<8x8xf32> to vector<8x8xbf16>
    %cst_270 = arith.constant dense<0.000000e+00> : vector<8x8xf32>
    %411 = tpu.matmul %409, %410, %cst_270 {dimension_numbers = #tpu.dot_dimension_numbers<[1], [0], [0], [1], [0, 0, 1, 1], [], []>} : vector<8x8xbf16>, vector<8x8xbf16>, vector<8x8xf32> -> vector<8x8xf32>
    %412 = arith.truncf %411 : vector<8x8xf32> to vector<8x8xbf16>
    %c1_271 = arith.constant 1 : index
    %c2_272 = arith.constant 2 : index
    %c0_273 = arith.constant 0 : index
    %c0_274 = arith.constant 0 : index
    %413 = vector.load %arg5[%c1_271, %c2_272, %c0_273, %c0_274] : memref<2x4x8x32xbf16, #tpu.memory_space<vmem>>, vector<1x1x8x32xbf16>
    %414 = vector.shape_cast %413 : vector<1x1x8x32xbf16> to vector<8x32xbf16>
    %cst_275 = arith.constant dense<0.000000e+00> : vector<8x32xf32>
    %415 = tpu.matmul %412, %414, %cst_275 {dimension_numbers = #tpu.dot_dimension_numbers<[1], [0], [0], [1], [0, 0, 1, 1], [], []>} : vector<8x8xbf16>, vector<8x32xbf16>, vector<8x32xf32> -> vector<8x32xf32>
    %416 = arith.addf %370, %415 : vector<8x32xf32>
    %c1_276 = arith.constant 1 : index
    %c3_277 = arith.constant 3 : index
    %c0_278 = arith.constant 0 : index
    %c0_279 = arith.constant 0 : index
    %417 = vector.load %arg3[%c1_276, %c3_277, %c0_278, %c0_279] : memref<2x12x32x8xbf16, #tpu.memory_space<vmem>>, vector<1x1x32x8xbf16>
    %418 = vector.shape_cast %417 : vector<1x1x32x8xbf16> to vector<32x8xbf16>
    %c1_280 = arith.constant 1 : index
    %c3_281 = arith.constant 3 : index
    %c0_282 = arith.constant 0 : index
    %419 = vector.load %arg4[%c1_280, %c3_281, %c0_282] : memref<2x12x8xf32, #tpu.memory_space<vmem>>, vector<1x1x8xf32>
    %420 = vector.shape_cast %419 : vector<1x1x8xf32> to vector<1x8xf32>
    %cst_283 = arith.constant dense<0.000000e+00> : vector<8x8xf32>
    %421 = tpu.matmul %277, %418, %cst_283 {dimension_numbers = #tpu.dot_dimension_numbers<[1], [0], [0], [1], [0, 0, 1, 1], [], []>} : vector<8x32xbf16>, vector<32x8xbf16>, vector<8x8xf32> -> vector<8x8xf32>
    %422 = vector.broadcast %420 : vector<1x8xf32> to vector<8x8xf32>
    %423 = arith.addf %421, %422 : vector<8x8xf32>
    %c1_284 = arith.constant 1 : index
    %c7_285 = arith.constant 7 : index
    %c0_286 = arith.constant 0 : index
    %c0_287 = arith.constant 0 : index
    %424 = vector.load %arg3[%c1_284, %c7_285, %c0_286, %c0_287] : memref<2x12x32x8xbf16, #tpu.memory_space<vmem>>, vector<1x1x32x8xbf16>
    %425 = vector.shape_cast %424 : vector<1x1x32x8xbf16> to vector<32x8xbf16>
    %c1_288 = arith.constant 1 : index
    %c7_289 = arith.constant 7 : index
    %c0_290 = arith.constant 0 : index
    %426 = vector.load %arg4[%c1_288, %c7_289, %c0_290] : memref<2x12x8xf32, #tpu.memory_space<vmem>>, vector<1x1x8xf32>
    %427 = vector.shape_cast %426 : vector<1x1x8xf32> to vector<1x8xf32>
    %cst_291 = arith.constant dense<0.000000e+00> : vector<8x8xf32>
    %428 = tpu.matmul %277, %425, %cst_291 {dimension_numbers = #tpu.dot_dimension_numbers<[1], [0], [0], [1], [0, 0, 1, 1], [], []>} : vector<8x32xbf16>, vector<32x8xbf16>, vector<8x8xf32> -> vector<8x8xf32>
    %429 = vector.broadcast %427 : vector<1x8xf32> to vector<8x8xf32>
    %430 = arith.addf %428, %429 : vector<8x8xf32>
    %c1_292 = arith.constant 1 : index
    %c11_293 = arith.constant 11 : index
    %c0_294 = arith.constant 0 : index
    %c0_295 = arith.constant 0 : index
    %431 = vector.load %arg3[%c1_292, %c11_293, %c0_294, %c0_295] : memref<2x12x32x8xbf16, #tpu.memory_space<vmem>>, vector<1x1x32x8xbf16>
    %432 = vector.shape_cast %431 : vector<1x1x32x8xbf16> to vector<32x8xbf16>
    %c1_296 = arith.constant 1 : index
    %c11_297 = arith.constant 11 : index
    %c0_298 = arith.constant 0 : index
    %433 = vector.load %arg4[%c1_296, %c11_297, %c0_298] : memref<2x12x8xf32, #tpu.memory_space<vmem>>, vector<1x1x8xf32>
    %434 = vector.shape_cast %433 : vector<1x1x8xf32> to vector<1x8xf32>
    %cst_299 = arith.constant dense<0.000000e+00> : vector<8x8xf32>
    %435 = tpu.matmul %277, %432, %cst_299 {dimension_numbers = #tpu.dot_dimension_numbers<[1], [0], [0], [1], [0, 0, 1, 1], [], []>} : vector<8x32xbf16>, vector<32x8xbf16>, vector<8x8xf32> -> vector<8x8xf32>
    %436 = vector.broadcast %434 : vector<1x8xf32> to vector<8x8xf32>
    %437 = arith.addf %435, %436 : vector<8x8xf32>
    %438 = arith.truncf %423 : vector<8x8xf32> to vector<8x8xbf16>
    %439 = arith.truncf %430 : vector<8x8xf32> to vector<8x8xbf16>
    "tpu.trace_start"() <{level = 10 : i32, message = "qd,kd->qk"}> : () -> ()
    %cst_300 = arith.constant dense<0.000000e+00> : vector<8x8xf32>
    %440 = tpu.matmul %438, %439, %cst_300 {dimension_numbers = #tpu.dot_dimension_numbers<[1], [1], [0], [0], [0, 0, 1, 0], [], []>} : vector<8x8xbf16>, vector<8x8xbf16>, vector<8x8xf32> -> vector<8x8xf32>
    "tpu.trace_stop"() : () -> ()
    %cst_301 = arith.constant 0.353553385 : f32
    %441 = vector.broadcast %cst_301 : f32 to vector<8x8xf32>
    %442 = arith.mulf %440, %441 : vector<8x8xf32>
    %443 = vector.broadcast %3 : vector<1x8xf32> to vector<8x8xf32>
    %444 = arith.addf %442, %443 : vector<8x8xf32>
    %cst_302 = arith.constant dense<0xFF800000> : vector<8xf32>
    %445 = vector.multi_reduction <maximumf>, %444, %cst_302 [1] : vector<8x8xf32> to vector<8xf32>
    %446 = vector.shape_cast %445 : vector<8xf32> to vector<8x1xf32>
    %447 = vector.broadcast %446 : vector<8x1xf32> to vector<8x8xf32>
    %448 = arith.subf %444, %447 : vector<8x8xf32>
    %449 = math.exp %448 : vector<8x8xf32>
    %cst_303 = arith.constant dense<0.000000e+00> : vector<8xf32>
    %450 = vector.multi_reduction <add>, %449, %cst_303 [1] : vector<8x8xf32> to vector<8xf32>
    %451 = vector.shape_cast %450 : vector<8xf32> to vector<8x1xf32>
    %452 = tpu.reciprocal %451 {approx = true} : vector<8x1xf32> -> vector<8x1xf32>
    %453 = vector.broadcast %452 : vector<8x1xf32> to vector<8x8xf32>
    %454 = arith.mulf %449, %453 : vector<8x8xf32>
    %455 = arith.truncf %454 : vector<8x8xf32> to vector<8x8xbf16>
    %456 = arith.truncf %437 : vector<8x8xf32> to vector<8x8xbf16>
    %cst_304 = arith.constant dense<0.000000e+00> : vector<8x8xf32>
    %457 = tpu.matmul %455, %456, %cst_304 {dimension_numbers = #tpu.dot_dimension_numbers<[1], [0], [0], [1], [0, 0, 1, 1], [], []>} : vector<8x8xbf16>, vector<8x8xbf16>, vector<8x8xf32> -> vector<8x8xf32>
    %458 = arith.truncf %457 : vector<8x8xf32> to vector<8x8xbf16>
    %c1_305 = arith.constant 1 : index
    %c3_306 = arith.constant 3 : index
    %c0_307 = arith.constant 0 : index
    %c0_308 = arith.constant 0 : index
    %459 = vector.load %arg5[%c1_305, %c3_306, %c0_307, %c0_308] : memref<2x4x8x32xbf16, #tpu.memory_space<vmem>>, vector<1x1x8x32xbf16>
    %460 = vector.shape_cast %459 : vector<1x1x8x32xbf16> to vector<8x32xbf16>
    %cst_309 = arith.constant dense<0.000000e+00> : vector<8x32xf32>
    %461 = tpu.matmul %458, %460, %cst_309 {dimension_numbers = #tpu.dot_dimension_numbers<[1], [0], [0], [1], [0, 0, 1, 1], [], []>} : vector<8x8xbf16>, vector<8x32xbf16>, vector<8x32xf32> -> vector<8x32xf32>
    %462 = arith.addf %416, %461 : vector<8x32xf32>
    %c1_310 = arith.constant 1 : index
    %c0_311 = arith.constant 0 : index
    %c0_312 = arith.constant 0 : index
    %463 = vector.load %arg9[%c1_310, %c0_311, %c0_312] : memref<2x6x32xf32, #tpu.memory_space<vmem>>, vector<1x1x32xf32>
    %464 = vector.shape_cast %463 : vector<1x1x32xf32> to vector<1x32xf32>
    %465 = vector.broadcast %464 : vector<1x32xf32> to vector<8x32xf32>
    %466 = arith.addf %462, %465 : vector<8x32xf32>
    %467 = arith.addf %276, %466 : vector<8x32xf32>
    %c1_313 = arith.constant 1 : index
    %c1_314 = arith.constant 1 : index
    %c0_315 = arith.constant 0 : index
    %468 = vector.load %arg9[%c1_313, %c1_314, %c0_315] : memref<2x6x32xf32, #tpu.memory_space<vmem>>, vector<1x1x32xf32>
    %469 = vector.shape_cast %468 : vector<1x1x32xf32> to vector<1x32xf32>
    %c1_316 = arith.constant 1 : index
    %c2_317 = arith.constant 2 : index
    %c0_318 = arith.constant 0 : index
    %470 = vector.load %arg9[%c1_316, %c2_317, %c0_318] : memref<2x6x32xf32, #tpu.memory_space<vmem>>, vector<1x1x32xf32>
    %471 = vector.shape_cast %470 : vector<1x1x32xf32> to vector<1x32xf32>
    %cst_319 = arith.constant dense<0.000000e+00> : vector<8xf32>
    %472 = vector.multi_reduction <add>, %467, %cst_319 [1] : vector<8x32xf32> to vector<8xf32>
    %473 = vector.shape_cast %472 : vector<8xf32> to vector<8x1xf32>
    %cst_320 = arith.constant 3.200000e+01 : f32
    %474 = vector.broadcast %cst_320 : f32 to vector<8x1xf32>
    %475 = arith.divf %473, %474 : vector<8x1xf32>
    %476 = vector.broadcast %475 : vector<8x1xf32> to vector<8x32xf32>
    %477 = arith.subf %467, %476 : vector<8x32xf32>
    %478 = arith.mulf %477, %477 : vector<8x32xf32>
    %cst_321 = arith.constant dense<0.000000e+00> : vector<8xf32>
    %479 = vector.multi_reduction <add>, %478, %cst_321 [1] : vector<8x32xf32> to vector<8xf32>
    %480 = vector.shape_cast %479 : vector<8xf32> to vector<8x1xf32>
    %cst_322 = arith.constant 3.200000e+01 : f32
    %481 = vector.broadcast %cst_322 : f32 to vector<8x1xf32>
    %482 = arith.divf %480, %481 : vector<8x1xf32>
    %483 = vector.broadcast %475 : vector<8x1xf32> to vector<8x32xf32>
    %484 = arith.subf %467, %483 : vector<8x32xf32>
    %cst_323 = arith.constant 9.99999974E-6 : f32
    %485 = vector.broadcast %cst_323 : f32 to vector<8x1xf32>
    %486 = arith.addf %482, %485 : vector<8x1xf32>
    %487 = math.rsqrt %486 : vector<8x1xf32>
    %488 = vector.broadcast %487 : vector<8x1xf32> to vector<8x32xf32>
    %489 = arith.mulf %484, %488 : vector<8x32xf32>
    %490 = vector.broadcast %469 : vector<1x32xf32> to vector<8x32xf32>
    %491 = arith.mulf %489, %490 : vector<8x32xf32>
    %492 = vector.broadcast %471 : vector<1x32xf32> to vector<8x32xf32>
    %493 = arith.addf %491, %492 : vector<8x32xf32>
    %494 = arith.truncf %493 : vector<8x32xf32> to vector<8x32xbf16>
    %c1_324 = arith.constant 1 : index
    %c0_325 = arith.constant 0 : index
    %c0_326 = arith.constant 0 : index
    %495 = vector.load %arg6[%c1_324, %c0_325, %c0_326] : memref<2x32x64xbf16, #tpu.memory_space<vmem>>, vector<1x32x64xbf16>
    %496 = vector.shape_cast %495 : vector<1x32x64xbf16> to vector<32x64xbf16>
    %cst_327 = arith.constant dense<0.000000e+00> : vector<8x64xf32>
    %497 = tpu.matmul %494, %496, %cst_327 {dimension_numbers = #tpu.dot_dimension_numbers<[1], [0], [0], [1], [0, 0, 1, 1], [], []>} : vector<8x32xbf16>, vector<32x64xbf16>, vector<8x64xf32> -> vector<8x64xf32>
    %c1_328 = arith.constant 1 : index
    %c0_329 = arith.constant 0 : index
    %c0_330 = arith.constant 0 : index
    %498 = vector.load %arg7[%c1_328, %c0_329, %c0_330] : memref<2x1x64xf32, #tpu.memory_space<vmem>>, vector<1x1x64xf32>
    %499 = vector.shape_cast %498 : vector<1x1x64xf32> to vector<1x64xf32>
    %500 = vector.broadcast %499 : vector<1x64xf32> to vector<8x64xf32>
    %501 = arith.addf %497, %500 : vector<8x64xf32>
    %cst_331 = arith.constant 5.000000e-01 : f32
    %502 = vector.broadcast %cst_331 : f32 to vector<8x64xf32>
    %503 = arith.mulf %502, %501 : vector<8x64xf32>
    %cst_332 = arith.constant 4.471500e-02 : f32
    %504 = vector.broadcast %cst_332 : f32 to vector<8x64xf32>
    %505 = arith.mulf %504, %501 : vector<8x64xf32>
    %506 = arith.mulf %505, %501 : vector<8x64xf32>
    %507 = arith.mulf %506, %501 : vector<8x64xf32>
    %508 = arith.addf %501, %507 : vector<8x64xf32>
    %cst_333 = arith.constant 0.797884583 : f32
    %509 = vector.broadcast %cst_333 : f32 to vector<8x64xf32>
    %510 = arith.mulf %509, %508 : vector<8x64xf32>
    %511 = math.tanh %510 : vector<8x64xf32>
    %cst_334 = arith.constant 1.000000e+00 : f32
    %512 = vector.broadcast %cst_334 : f32 to vector<8x64xf32>
    %513 = arith.addf %512, %511 : vector<8x64xf32>
    %514 = arith.mulf %503, %513 : vector<8x64xf32>
    %515 = arith.truncf %514 : vector<8x64xf32> to vector<8x64xbf16>
    %c1_335 = arith.constant 1 : index
    %c0_336 = arith.constant 0 : index
    %c0_337 = arith.constant 0 : index
    %516 = vector.load %arg8[%c1_335, %c0_336, %c0_337] : memref<2x64x32xbf16, #tpu.memory_space<vmem>>, vector<1x64x32xbf16>
    %517 = vector.shape_cast %516 : vector<1x64x32xbf16> to vector<64x32xbf16>
    %cst_338 = arith.constant dense<0.000000e+00> : vector<8x32xf32>
    %518 = tpu.matmul %515, %517, %cst_338 {dimension_numbers = #tpu.dot_dimension_numbers<[1], [0], [0], [1], [0, 0, 1, 1], [], []>} : vector<8x64xbf16>, vector<64x32xbf16>, vector<8x32xf32> -> vector<8x32xf32>
    %c1_339 = arith.constant 1 : index
    %c3_340 = arith.constant 3 : index
    %c0_341 = arith.constant 0 : index
    %519 = vector.load %arg9[%c1_339, %c3_340, %c0_341] : memref<2x6x32xf32, #tpu.memory_space<vmem>>, vector<1x1x32xf32>
    %520 = vector.shape_cast %519 : vector<1x1x32xf32> to vector<1x32xf32>
    %521 = vector.broadcast %520 : vector<1x32xf32> to vector<8x32xf32>
    %522 = arith.addf %518, %521 : vector<8x32xf32>
    %523 = arith.addf %493, %522 : vector<8x32xf32>
    %c1_342 = arith.constant 1 : index
    %c4_343 = arith.constant 4 : index
    %c0_344 = arith.constant 0 : index
    %524 = vector.load %arg9[%c1_342, %c4_343, %c0_344] : memref<2x6x32xf32, #tpu.memory_space<vmem>>, vector<1x1x32xf32>
    %525 = vector.shape_cast %524 : vector<1x1x32xf32> to vector<1x32xf32>
    %c1_345 = arith.constant 1 : index
    %c5_346 = arith.constant 5 : index
    %c0_347 = arith.constant 0 : index
    %526 = vector.load %arg9[%c1_345, %c5_346, %c0_347] : memref<2x6x32xf32, #tpu.memory_space<vmem>>, vector<1x1x32xf32>
    %527 = vector.shape_cast %526 : vector<1x1x32xf32> to vector<1x32xf32>
    %cst_348 = arith.constant dense<0.000000e+00> : vector<8xf32>
    %528 = vector.multi_reduction <add>, %523, %cst_348 [1] : vector<8x32xf32> to vector<8xf32>
    %529 = vector.shape_cast %528 : vector<8xf32> to vector<8x1xf32>
    %cst_349 = arith.constant 3.200000e+01 : f32
    %530 = vector.broadcast %cst_349 : f32 to vector<8x1xf32>
    %531 = arith.divf %529, %530 : vector<8x1xf32>
    %532 = vector.broadcast %531 : vector<8x1xf32> to vector<8x32xf32>
    %533 = arith.subf %523, %532 : vector<8x32xf32>
    %534 = arith.mulf %533, %533 : vector<8x32xf32>
    %cst_350 = arith.constant dense<0.000000e+00> : vector<8xf32>
    %535 = vector.multi_reduction <add>, %534, %cst_350 [1] : vector<8x32xf32> to vector<8xf32>
    %536 = vector.shape_cast %535 : vector<8xf32> to vector<8x1xf32>
    %cst_351 = arith.constant 3.200000e+01 : f32
    %537 = vector.broadcast %cst_351 : f32 to vector<8x1xf32>
    %538 = arith.divf %536, %537 : vector<8x1xf32>
    %539 = vector.broadcast %531 : vector<8x1xf32> to vector<8x32xf32>
    %540 = arith.subf %523, %539 : vector<8x32xf32>
    %cst_352 = arith.constant 9.99999974E-6 : f32
    %541 = vector.broadcast %cst_352 : f32 to vector<8x1xf32>
    %542 = arith.addf %538, %541 : vector<8x1xf32>
    %543 = math.rsqrt %542 : vector<8x1xf32>
    %544 = vector.broadcast %543 : vector<8x1xf32> to vector<8x32xf32>
    %545 = arith.mulf %540, %544 : vector<8x32xf32>
    %546 = vector.broadcast %525 : vector<1x32xf32> to vector<8x32xf32>
    %547 = arith.mulf %545, %546 : vector<8x32xf32>
    %548 = vector.broadcast %527 : vector<1x32xf32> to vector<8x32xf32>
    %549 = arith.addf %547, %548 : vector<8x32xf32>
    %550 = vector.extract_strided_slice %549 {offsets = [0, 0], sizes = [1, 32], strides = [1, 1]} : vector<8x32xf32> to vector<1x32xf32>
    %551 = arith.truncf %550 : vector<1x32xf32> to vector<1x32xbf16>
    %c0_353 = arith.constant 0 : index
    %c0_354 = arith.constant 0 : index
    %552 = vector.load %arg10[%c0_353, %c0_354] : memref<32x256xbf16, #tpu.memory_space<vmem>>, vector<32x256xbf16>
    %cst_355 = arith.constant dense<0.000000e+00> : vector<1x256xf32>
    %553 = tpu.matmul %551, %552, %cst_355 {dimension_numbers = #tpu.dot_dimension_numbers<[1], [0], [0], [1], [0, 0, 1, 1], [], []>} : vector<1x32xbf16>, vector<32x256xbf16>, vector<1x256xf32> -> vector<1x256xf32>
    %c0_356 = arith.constant 0 : index
    %c0_357 = arith.constant 0 : index
    %554 = vector.load %arg11[%c0_356, %c0_357] : memref<1x256xf32, #tpu.memory_space<vmem>>, vector<1x256xf32>
    %555 = arith.addf %553, %554 : vector<1x256xf32>
    %cst_358 = arith.constant 0.000000e+00 : f32
    %556 = vector.broadcast %cst_358 : f32 to vector<1x256xf32>
    %557 = arith.maximumf %555, %556 : vector<1x256xf32>
    %558 = arith.truncf %557 : vector<1x256xf32> to vector<1x256xbf16>
    %c0_359 = arith.constant 0 : index
    %c0_360 = arith.constant 0 : index
    %559 = vector.load %arg12[%c0_359, %c0_360] : memref<256x128xbf16, #tpu.memory_space<vmem>>, vector<256x128xbf16>
    %cst_361 = arith.constant dense<0.000000e+00> : vector<1x128xf32>
    %560 = tpu.matmul %558, %559, %cst_361 {dimension_numbers = #tpu.dot_dimension_numbers<[1], [0], [0], [1], [0, 0, 1, 1], [], []>} : vector<1x256xbf16>, vector<256x128xbf16>, vector<1x128xf32> -> vector<1x128xf32>
    %c0_362 = arith.constant 0 : index
    %c0_363 = arith.constant 0 : index
    %561 = vector.load %arg13[%c0_362, %c0_363] : memref<1x128xf32, #tpu.memory_space<vmem>>, vector<1x128xf32>
    %562 = arith.addf %560, %561 : vector<1x128xf32>
    %cst_364 = arith.constant 0.000000e+00 : f32
    %563 = vector.broadcast %cst_364 : f32 to vector<1x128xf32>
    %564 = arith.subf %563, %562 : vector<1x128xf32>
    %565 = math.exp %564 : vector<1x128xf32>
    %cst_365 = arith.constant 1.000000e+00 : f32
    %566 = vector.broadcast %cst_365 : f32 to vector<1x128xf32>
    %567 = arith.addf %566, %565 : vector<1x128xf32>
    %cst_366 = arith.constant 1.000000e+00 : f32
    %568 = vector.broadcast %cst_366 : f32 to vector<1x128xf32>
    %569 = arith.divf %568, %567 : vector<1x128xf32>
    %c0_367 = arith.constant 0 : index
    %c0_368 = arith.constant 0 : index
    %c0_369 = arith.constant 0 : index
    %570 = vector.load %arg14[%c0_367, %c0_368, %c0_369] : memref<1x1x128xf32, #tpu.memory_space<vmem>>, vector<1x1x128xf32>
    %571 = vector.shape_cast %570 : vector<1x1x128xf32> to vector<1x128xf32>
    %572 = vector.shape_cast %569 : vector<1x128xf32> to vector<1x1x128xf32>
    tpu.vector_store %arg14[%c0_367, %c0_368, %c0_369], %572 {strides = array<i32>} : memref<1x1x128xf32, #tpu.memory_space<vmem>>, vector<1x1x128xf32>,
    return
  }
  func.func @transform_0(%arg0: i32) -> (i32, i32, i32) {
    %c0_i32 = arith.constant 0 : i32
    %c0_i32_0 = arith.constant 0 : i32
    %c0_i32_1 = arith.constant 0 : i32
    return %arg0, %c0_i32, %c0_i32_0 : i32, i32, i32
  }
  func.func @transform_1(%arg0: i32) -> (i32, i32, i32) {
    %c0_i32 = arith.constant 0 : i32
    %c0_i32_0 = arith.constant 0 : i32
    %c0_i32_1 = arith.constant 0 : i32
    return %arg0, %c0_i32, %c0_i32_0 : i32, i32, i32
  }
  func.func @transform_2(%arg0: i32) -> (i32, i32, i32, i32) {
    %c0_i32 = arith.constant 0 : i32
    %c0_i32_0 = arith.constant 0 : i32
    %c0_i32_1 = arith.constant 0 : i32
    %c0_i32_2 = arith.constant 0 : i32
    %c0_i32_3 = arith.constant 0 : i32
    return %c0_i32, %c0_i32_0, %c0_i32_1, %c0_i32_2 : i32, i32, i32, i32
  }
  func.func @transform_3(%arg0: i32) -> (i32, i32, i32) {
    %c0_i32 = arith.constant 0 : i32
    %c0_i32_0 = arith.constant 0 : i32
    %c0_i32_1 = arith.constant 0 : i32
    %c0_i32_2 = arith.constant 0 : i32
    return %c0_i32, %c0_i32_0, %c0_i32_1 : i32, i32, i32
  }
  func.func @transform_4(%arg0: i32) -> (i32, i32, i32, i32) {
    %c0_i32 = arith.constant 0 : i32
    %c0_i32_0 = arith.constant 0 : i32
    %c0_i32_1 = arith.constant 0 : i32
    %c0_i32_2 = arith.constant 0 : i32
    %c0_i32_3 = arith.constant 0 : i32
    return %c0_i32, %c0_i32_0, %c0_i32_1, %c0_i32_2 : i32, i32, i32, i32
  }
  func.func @transform_5(%arg0: i32) -> (i32, i32, i32) {
    %c0_i32 = arith.constant 0 : i32
    %c0_i32_0 = arith.constant 0 : i32
    %c0_i32_1 = arith.constant 0 : i32
    %c0_i32_2 = arith.constant 0 : i32
    return %c0_i32, %c0_i32_0, %c0_i32_1 : i32, i32, i32
  }
  func.func @transform_6(%arg0: i32) -> (i32, i32, i32) {
    %c0_i32 = arith.constant 0 : i32
    %c0_i32_0 = arith.constant 0 : i32
    %c0_i32_1 = arith.constant 0 : i32
    %c0_i32_2 = arith.constant 0 : i32
    return %c0_i32, %c0_i32_0, %c0_i32_1 : i32, i32, i32
  }
  func.func @transform_7(%arg0: i32) -> (i32, i32, i32) {
    %c0_i32 = arith.constant 0 : i32
    %c0_i32_0 = arith.constant 0 : i32
    %c0_i32_1 = arith.constant 0 : i32
    %c0_i32_2 = arith.constant 0 : i32
    return %c0_i32, %c0_i32_0, %c0_i32_1 : i32, i32, i32
  }
  func.func @transform_8(%arg0: i32) -> (i32, i32, i32) {
    %c0_i32 = arith.constant 0 : i32
    %c0_i32_0 = arith.constant 0 : i32
    %c0_i32_1 = arith.constant 0 : i32
    %c0_i32_2 = arith.constant 0 : i32
    return %c0_i32, %c0_i32_0, %c0_i32_1 : i32, i32, i32
  }
  func.func @transform_9(%arg0: i32) -> (i32, i32) {
    %c0_i32 = arith.constant 0 : i32
    %c0_i32_0 = arith.constant 0 : i32
    %c0_i32_1 = arith.constant 0 : i32
    return %c0_i32, %c0_i32_0 : i32, i32
  }
  func.func @transform_10(%arg0: i32) -> (i32, i32) {
    %c0_i32 = arith.constant 0 : i32
    %c0_i32_0 = arith.constant 0 : i32
    %c0_i32_1 = arith.constant 0 : i32
    return %c0_i32, %c0_i32_0 : i32, i32
  }
  func.func @transform_11(%arg0: i32) -> (i32, i32) {
    %c0_i32 = arith.constant 0 : i32
    %c0_i32_0 = arith.constant 0 : i32
    %c0_i32_1 = arith.constant 0 : i32
    return %c0_i32, %c0_i32_0 : i32, i32
  }
  func.func @transform_12(%arg0: i32) -> (i32, i32) {
    %c0_i32 = arith.constant 0 : i32
    %c0_i32_0 = arith.constant 0 : i32
    %c0_i32_1 = arith.constant 0 : i32
    return %c0_i32, %c0_i32_0 : i32, i32
  }
  func.func @transform_13(%arg0: i32) -> (i32, i32, i32) {
    %c0_i32 = arith.constant 0 : i32
    %c0_i32_0 = arith.constant 0 : i32
    %c0_i32_1 = arith.constant 0 : i32
    return %arg0, %c0_i32, %c0_i32_0 : i32, i32, i32
  }
}

</mosaic_0001>

<bundles_post_ra>
// kernel: bert_model_forward.1
= control target key start
LH: loop header
LB: loop body
LE: loop exit
PB: predicated region body
PF: predicated region fallthrough
CT: control target
= control target key end

     0   :  { %18 = vsyncpa [#allocation3], 0  ;;  %s4009_s0 = inlined_call_operand.vmem [shape: f32[2,8,32], index: 0, kind: input, shape index: {}]   ;;  %s4010_s1 = inlined_call_operand.vmem [shape: f32[2,1,8], index: 1, kind: input, shape index: {}]   ;;  %s4011_s2 = inlined_call_operand.vmem [shape: bf16[2,12,32,8], index: 2, kind: input, shape index: {}]   ;;  %s4012_s3 = inlined_call_operand.vmem [shape: f32[2,12,8], index: 3, kind: input, shape index: {}]   ;;  %s4013_s4 = inlined_call_operand.vmem [shape: bf16[2,4,8,32], index: 4, kind: input, shape index: {}]   ;;  %s4014_s5 = inlined_call_operand.vmem [shape: bf16[2,32,64], index: 5, kind: input, shape index: {}]   ;;  %s4015_s6 = inlined_call_operand.vmem [shape: f32[2,1,64], index: 6, kind: input, shape index: {}]   ;;  %s4016_s7 = inlined_call_operand.vmem [shape: bf16[2,64,32], index: 7, kind: input, shape index: {}]   ;;  %s4017_s8 = inlined_call_operand.vmem [shape: f32[2,6,32], index: 8, kind: input, shape index: {}]   ;;  %s4018_s9 = inlined_call_operand.vmem [shape: bf16[32,256], index: 9, kind: input, shape index: {}]   ;;  %s4019_s10 = inlined_call_operand.vmem [shape: f32[1,256], index: 10, kind: input, shape index: {}]   ;;  %s4020_s11 = inlined_call_operand.vmem [shape: bf16[256,128], index: 11, kind: input, shape index: {}]   ;;  %s4021_s12 = inlined_call_operand.vmem [shape: f32[1,128], index: 12, kind: input, shape index: {}]   ;;  %s4022_s13 = inlined_call_operand.hbm [shape: f32[2,1,128], index: 13, kind: output, shape index: {}]  }
   0x1   :  { %20 = vsyncpa [#allocation3 + $0x1], 0  ;;  %s3353_s25 = smov 0   ;;  %s3355_s26 = smov 0  }
   0x2   :  { %s3357_s27 = smov 0   ;;  %s3359_s28 = smov 0  }
   0x3 LB: > { %4026 = sst [smem:[#allocation5_spill]] %s3276_s27  ;;  %s3374_s29 = sadd.s32 4294967295, %s3280_s28   ;;  %s3280_s28 = sphi %s3359_s28, %s4031_s28   ;;  %s3276_s27 = sphi %s3357_s27, %s4033_s27   ;;  %s3272_s26 = sphi %s3355_s26, %s4035_s26   ;;  %s3268_s25 = sphi %s3353_s25, %s4034_s25  }
   0x4   : > { %s2497_s30 = sadd.s32 4294967294, %s3280_s28   ;;  %s3378_s14 = sadd.s32 1, %s3280_s28  }
   0x5   : > { %4027 = sst [smem:[#allocation6_spill]] %s3378_s14  ;;  %s316_s15 = sadd.s32 1, %s3276_s27 }
   0x6   : > { %s313_s16 = ssub.s32 %s3280_s28, %s3378_s14  ;;  %p326_p0 = scmp.ne.s32.totalorder %s3276_s27, %s3272_s26 }
   0x7   : > { %p314_p1 = scmp.eq.s32.totalorder %s313_s16, 0  ;;  %p327_p2 = scmp.eq.s32.totalorder %s3374_s29, 1 }
   0x8   : > { %p332_p3 = scmp.ne.s32.totalorder %s3272_s26, %s3268_s25  ;;  %p333_p4 = scmp.eq.s32.totalorder %s2497_s30, 1 }
   0x9   : > { %s3389_s17 = scalar_select %p314_p1, %s3276_s27, %s316_s15  }
   0xa   : > { %p3391_p5 = por %p327_p2, %p326_p0  ;;  %p3395_p6 = por %p333_p4, %p332_p3 }
   0xb   : > { %4028 = sst [smem:[#allocation7_spill]] %s3389_s17  ;;  %p2500_p7 = scmp.ge.s32.totalorder %s3280_s28, 1 }
   0xc   : > { %p397_p8 = scmp.lt.s32.totalorder %s3280_s28, 3 }
   0xe   : > { %p398_p9 = pnand %p2500_p7, %p397_p8 }
   0xf   : > { %p442_p10 = scmp.lt.s32.totalorder (!%p398_p9), %s3374_s29, 1  ;;  %s440_s23 = sand.u32 (!%p398_p9), 1, %s3272_s26  }
  0x10   : > { %401 = sbr.rel (%p398_p9) target bundleno = 6551 (0x1997), region = 72  ;;  %s441_s24 = scalar_lea.vmem (!%p398_p9), [#allocation2], %s440_s23 }
  0x11   : > { %s2431_s30 = sshll.u32 (!%p398_p9), %s441_s24, 4  ;;  %s3238_s27 = scalar_lea.hbm (!%p398_p9), %s4022_s13, 2  ;;  %s2432_s30 = int_to_ptr.vmem [resolvable:$true] %s2431_s30 }
  0x15   : > { %v3009_v0 = vld [vmem:[%s4011_s2 + $0x8] sm:$0xff]  ;;  %v3008_v2 = vld [vmem:[%s4011_s2] sm:$0xff]  ;;  %s443_s17 = scalar_select %p442_p10, %s3374_s29, 1  ;;  %vm471_vm0 = vcmask 261120   ;;  %vm554_vm1 = vcmask 64512   ;;  %v3017_v19 = vld [vmem:[%s4011_s2 + $0x58] sm:$0xff] }
  0x16   : > { %v3011_v1 = vld [vmem:[%s4011_s2 + $0x48] sm:$0xff]  ;;  %481 = vmatpush.bf16.msra.mxu0 %v3009_v0  ;;  %v3010_v3 = vld [vmem:[%s4011_s2 + $0x40] sm:$0xff]  ;;  %v3016_v26 = vld [vmem:[%s4011_s2 + $0x50] sm:$0xff]  ;;  %vm595_vm2 = vcmask 1043456   ;;  %vm1274_vm7 = vcmask 523264  }
  0x17   : > { %513 = vmatpush.bf16.msra.mxu1 %v3011_v1  ;;  %s2501_s20 = sshll.u32 %s443_s17, 3  ;;  %v3129_v6 = vld [vmem:[%s4012_s3 + $0x4] ss:$0 sm:$0xff]  ;;  %v3128_v9 = vld [vmem:[%s4012_s3] ss:$0 sm:$0xff]  ;;  %s3439_s15 = scalar_lea.vmem %s4010_s1, %s443_s17  ;;  %v3013_v17 = vld [vmem:[%s4011_s2 + $0x88] sm:$0xff] }
  0x18   : > { %s445_s14 = scalar_lea.vmem %s4009_s0, %s2501_s20  ;;  %545 = vmatpush.bf16.msra.mxu2 %v3013_v17  ;;  %v3012_v18 = vld [vmem:[%s4011_s2 + $0x80] sm:$0xff]  ;;  %v3015_v27 = vld [vmem:[%s4011_s2 + $0x18] sm:$0xff]  ;;  %v3014_v28 = vld [vmem:[%s4011_s2 + $0x10] sm:$0xff]  ;;  %s2421_s20 = scalar_lea.sflag [#allocation3], %s440_s23 }
  0x19   : > { %v3418_v4 = vld [vmem:[%s445_s14] sm:$0xff]  ;;  %v3131_v36 = vld [vmem:[%s4012_s3 + $0x8] ss:$0 sm:$0xff]  ;;  %v3019_v48 = vld [vmem:[%s4011_s2 + $0x98] sm:$0xff]  ;;  %s2429_s14 = scalar_lea.hbm %s4022_s13, %s3374_s29 }
  0x1a   : > { %482 = vmatpush.bf16.msra.mxu0 %v3008_v2  ;;  %v3422_v5 = vpack.c.bf16 %v3418_v4, %v3418_v4  ;;  %v3453_v20 = vld [vmem:[%s3439_s15] ss:$0 sm:$0xff]  ;;  %v3132_v41 = vld [vmem:[%s4012_s3 + $0x5] ss:$0 sm:$0xff]  ;;  %v3018_v49 = vld [vmem:[%s4011_s2 + $0x90] sm:$0xff]  ;;  %s2433_s16 = sshll.u32 %s2429_s14, 4  ;;  %s2434_s16 = int_to_ptr.hbm [resolvable:$true] %s2433_s16 }
  0x1b   : > { %514 = vmatpush.bf16.msra.mxu1 %v3010_v3  ;;  %v3133_v54 = vld [vmem:[%s4012_s3 + $0x1] ss:$0 sm:$0xff]  ;;  %v3134_v59 = vld [vmem:[%s4012_s3 + $0x9] ss:$0 sm:$0xff]  ;;  %s3232_s29 = sshra.s32 %s2434_s16, 4  ;;  %s3233_s29 = int_to_ptr.hbm [resolvable:$true] %s3232_s29 }
  0x1c   : > { %546 = vmatpush.bf16.msra.mxu2 %v3012_v18  ;;  %v613_v57 = vld [vmem:[%s4013_s4] sm:$0xf]  ;;  %v3021_v18 = vld [vmem:[%s4011_s2 + $0x28] sm:$0xff]  ;;  %s3234_s21 = scalar_lea.hbm %s3233_s29, 1  ;;  %p3239_p0 = scmp.lt.s32.totalorder %s3233_s29, %s4022_s13 }
  0x1d   : > { %2510 = vmatmul.msk.bf16.vlgmr.msra.gmra.mxu0 %vm471_vm0, %v3422_v5  ;;  %v791_v58 = vsel %vm595_vm2, %v613_v57, 0  ;;  %p3235_p11 = scmp.ne.s32.totalorder %s3233_s29, %s3234_s21  ;;  %p3240_p1 = scmp.lt.s32.totalorder %s3238_s27, %s3234_s21 }
  0x1e   : > { %2523 = vmatmul.msk.bf16.vlgmr.msra.gmra.mxu1 %vm471_vm0, %v3422_v5 }
  0x1f   : > { %2536 = vmatmul.msk.bf16.vlgmr.msra.gmra.mxu2 %vm471_vm0, %v3422_v5  ;;  %639 = vmatpush.bf16.msrb.mxu1 %v3015_v27  ;;  %v2580_v27 = vld [vmem:[%s4013_s4 + $0x4] sm:$0xf]  ;;  %p3236_p12 = pnand %p3235_p11, %p3391_p5  ;;  %p3241_p2 = por %p3240_p1, %p3239_p0 }
  0x20   : > { %671 = vmatpush.bf16.msrb.mxu2 %v3017_v19  ;;  %v3023_v19 = vld [vmem:[%s4011_s2 + $0x68] sm:$0xff] }
  0x21   : > { %p3237_p13 = pneg %p3236_p12 }
  0x23   : > { %640 = vmatpush.bf16.msrb.mxu1 %v3014_v28  ;;  %v772_v28 = vsel %vm595_vm2, %v2580_v27, 0  ;;  %v3031_v27 = vld [vmem:[%s4011_s2 + $0xb8] sm:$0xff]  ;;  %p3242_p3 = pnand %p3241_p2, %p3237_p13 }
  0x24   : > { %672 = vmatpush.bf16.msrb.mxu2 %v3016_v26 }
  0x28   : > { %781 = vmatpush.bf16.msra.mxu2 %v772_v28  ;;  %v3030_v28 = vld [vmem:[%s4011_s2 + $0xb0] sm:$0xff] }
  0x2e   : > { %2551 = vmatmul.msk.bf16.vlgmr.msrb.gmra.mxu1 %vm471_vm0, %v3422_v5 }
  0x2f   : > { %2564 = vmatmul.msk.bf16.vlgmr.msrb.gmra.mxu2 %vm471_vm0, %v3422_v5 }
  0x9a   : > { %v484_v7 = vpop.f32.mrf.mxu0 }
  0x9b   : > { %v516_v8 = vpop.f32.mrf.mxu1  ;;  %v485_v12 = vadd.f32 %v3128_v9, %v484_v7 }
  0x9c   : > { %v517_v10 = vadd.f32 %v3129_v6, %v516_v8 }
  0x9d   : > { %v552_v16 = vpack.c.bf16 %v485_v12, %v485_v12 }
  0x9e   : > { %v553_v11 = vpack.c.bf16 %v517_v10, %v517_v10 }
  0xa0   : > { %v559_v13 = vsel %vm554_vm1, %v553_v11, 0 }
  0xa1   : > { %568 = vmatpush.bf16.xpose.msra.mxu3 %v559_v13 }
  0xa2   : > { %v486_v14 = vpop.f32.mrf.mxu0  ;;  %v548_v29 = vpop.f32.mrf.mxu2 }
  0xa3   : > { %v518_v15 = vpop.f32.mrf.mxu1  ;;  %v549_v37 = vadd.f32 %v3131_v36, %v548_v29  ;;  %v3135_v36 = vld [vmem:[%s4012_s3 + $0x2] ss:$0 sm:$0xff] }
  0xa5   : > { %v591_v38 = vpack.c.bf16 %v549_v37, %v549_v37 }
  0xa7   : > { %v597_v39 = vsel %vm595_vm2, %v591_v38, 0 }
  0xa8   : > { %2537 = vmatmul.msk.bf16.vlgmr.msra.gmra.mxu3 %vm554_vm1, %v552_v16  ;;  %606 = vmatpush.bf16.msrb.mxu0 %v597_v39 }
  0xa9   : > { %703 = vmatpush.bf16.msrb.mxu3 %v3019_v48 }
  0xaa   : > { %v550_v33 = vpop.f32.mrf.mxu2 }
  0xab   : > { %v642_v45 = vpop.f32.mrf.mxu1 }
  0xac   : > { %v643_v55 = vadd.f32 %v3133_v54, %v642_v45  ;;  %v3024_v45 = vld [vmem:[%s4011_s2 + $0xa0] sm:$0xff] }
  0xad   : > { %704 = vmatpush.bf16.msrb.mxu3 %v3018_v49 }
  0xae   : > { %v710_v56 = vpack.c.bf16 %v643_v55, %v643_v55 }
  0xb1   : > { %800 = vmatpush.bf16.msra.mxu3 %v791_v58 }
  0xb2   : > { %v674_v40 = vpop.f32.mrf.mxu2 }
  0xb3   : > { %v675_v42 = vadd.f32 %v3132_v41, %v674_v40  ;;  %v644_v47 = vpop.f32.mrf.mxu1 }
  0xb5   : > { %v711_v43 = vpack.c.bf16 %v675_v42, %v675_v42 }
  0xb7   : > { %v716_v44 = vsel %vm554_vm1, %v711_v43, 0 }
  0xb8   : > { %725 = vmatpush.bf16.xpose.msra.mxu0 %v716_v44  ;;  %2577 = vmatmul.msk.bf16.vlgmr.msrb.gmra.mxu3 %vm471_vm0, %v3422_v5  ;;  %v3025_v44 = vld [vmem:[%s4011_s2 + $0xa8] sm:$0xff] }
  0xb9   : > { %895 = vmatpush.bf16.msrb.mxu2 %v3025_v44 }
  0xba   : > { %v676_v46 = vpop.f32.mrf.mxu2 }
  0xbd   : > { %896 = vmatpush.bf16.msrb.mxu2 %v3024_v45 }
 0x12b   : > { %v570_v21 = vpop.f32.mrf.mxu3 }
 0x12c   : > { %v574_v22 = vmul.f32 0.35355338, %v570_v21  ;;  %v3020_v21 = vld [vmem:[%s4011_s2 + $0x20] sm:$0xff] }
 0x12e   : > { %v578_v23 = vadd.f32 %v3453_v20, %v574_v22  ;;  %v3022_v22 = vld [vmem:[%s4011_s2 + $0x60] sm:$0xff] }
 0x130   : > { %v579_v24 = vsel %vm554_vm1, %v578_v23, -inf }
 0x131   : > { %580 = vmax.xlane.f32.xlu0 %v579_v24 }
 0x133   : > { %v572_v25 = vpop.f32.mrf.mxu3 }
 0x13b   : > { %v706_v60 = vpop.f32.mrf.mxu3 }
 0x13c   : > { %v707_v62 = vadd.f32 %v3134_v59, %v706_v60 }
 0x13e   : > { %v745_v0 = vpack.c.bf16 %v707_v62, %v707_v62 }
 0x140   : > { %v750_v1 = vsel %vm595_vm2, %v745_v0, 0  ;;  %v3028_v0 = vld [vmem:[%s4011_s2 + $0x70] sm:$0xff] }
 0x141   : > { %759 = vmatpush.bf16.msra.mxu1 %v750_v1  ;;  %v3027_v1 = vld [vmem:[%s4011_s2 + $0x38] sm:$0xff] }
 0x143   : > { %v708_v2 = vpop.f32.mrf.mxu3 }
 0x144   : > { %v3026_v2 = vld [vmem:[%s4011_s2 + $0x30] sm:$0xff] }
 0x145   : > { %863 = vmatpush.bf16.msrb.mxu1 %v3023_v19 }
 0x149   : > { %864 = vmatpush.bf16.msrb.mxu1 %v3022_v22 }
 0x1a4   : > { %v581_v30 = vpop.xlane.xlu0 %580 }
 0x1a5   : > { %v582_v31 = vsub.f32 %v578_v23, %v581_v30 }
 0x1a7   : > { %v583_v32 = vmul.f32 1.442695, %v582_v31 }
 0x1a9   : > { %3167 = vpow2.f32 %v583_v32 }
 0x1af   : > { %v3168_v34 = vpop.eup %3167 }
 0x1b0   : > { %v585_v35 = vsel %vm554_vm1, %v3168_v34, 0.0 }
 0x1b1   : > { %586 = vadd.xlane.f32.xlu0 %v585_v35 }
 0x224   : > { %v587_v50 = vpop.xlane.xlu0 %586 }
 0x225   : > { %3169 = vrcp.f32 %v587_v50 }
 0x22b   : > { %v3170_v51 = vpop.eup %3169 }
 0x22c   : > { %v589_v52 = vmul.f32 %v3170_v51, %v3168_v34  ;;  %v3136_v34 = vld [vmem:[%s4012_s3 + $0x6] ss:$0 sm:$0xff] }
 0x22e   : > { %v590_v53 = vpack.c.bf16 %v589_v52, %v589_v52  ;;  %v3029_v52 = vld [vmem:[%s4011_s2 + $0x78] sm:$0xff] }
 0x230   : > { %2538 = vmatmul.msk.bf16.vlgmr.msrb.gmra.mxu0 %vm554_vm1, %v590_v53  ;;  %v3137_v53 = vld [vmem:[%s4012_s3 + $0xa] ss:$0 sm:$0xff] }
 0x231   : > { %831 = vmatpush.bf16.msrb.mxu0 %v3021_v18 }
 0x235   : > { %832 = vmatpush.bf16.msrb.mxu0 %v3020_v21 }
 0x240   : > { %2578 = vmatmul.msk.bf16.vlgmr.msra.gmra.mxu0 %vm554_vm1, %v710_v56 }
 0x250   : > { %2595 = vmatmul.msk.bf16.vlgmr.msrb.gmra.mxu0 %vm471_vm0, %v3422_v5 }
 0x2ad   : > { %v608_v61 = vpop.f32.mrf.mxu0 }
 0x2ae   : > { %v612_v63 = vpack.c.bf16 %v608_v61, %v608_v61 }
 0x2b0   : > { %2582 = vmatmul.msk.bf16.vlgmr.msra.gmra.mxu3 %vm554_vm1, %v612_v63 }
 0x2b5   : > { %v610_v3 = vpop.f32.mrf.mxu0 }
 0x2b6   : > { %v2624_v3 = vld [vmem:[%s4013_s4 + $0x8] sm:$0xf] }
 0x2bd   : > { %v727_v6 = vpop.f32.mrf.mxu0 }
 0x2be   : > { %v731_v7 = vmul.f32 0.35355338, %v727_v6  ;;  %v964_v6 = vsel %vm595_vm2, %v2624_v3, 0 }
 0x2c0   : > { %v732_v8 = vadd.f32 %v3453_v20, %v731_v7 }
 0x2c2   : > { %v733_v9 = vsel %vm554_vm1, %v732_v8, -inf }
 0x2c3   : > { %734 = vmax.xlane.f32.xlu1 %v733_v9 }
 0x2c5   : > { %v729_v10 = vpop.f32.mrf.mxu0 }
 0x2cd   : > { %v834_v29 = vpop.f32.mrf.mxu0 }
 0x2ce   : > { %v835_v39 = vadd.f32 %v3135_v36, %v834_v29 }
 0x2d0   : > { %v902_v42 = vpack.c.bf16 %v835_v39, %v835_v39 }
 0x2d5   : > { %v836_v30 = vpop.f32.mrf.mxu0 }
 0x333   : > { %v3503_v11 = vpop.f32.mrf.mxu3 }
 0x336   : > { %v735_v12 = vpop.xlane.xlu1 %734 }
 0x337   : > { %v736_v13 = vsub.f32 %v732_v8, %v735_v12  ;;  %v3138_v12 = vld [vmem:[%s4012_s3 + $0x7] ss:$0 sm:$0xff] }
 0x339   : > { %v737_v14 = vmul.f32 1.442695, %v736_v13 }
 0x33b   : > { %3171 = vpow2.f32 %v737_v14  ;;  %v804_v15 = vpop.f32.mrf.mxu3 }
 0x341   : > { %v3172_v16 = vpop.eup %3171 }
 0x342   : > { %v739_v17 = vsel %vm554_vm1, %v3172_v16, 0.0 }
 0x343   : > { %740 = vadd.xlane.f32.xlu1 %v739_v17 }
 0x3b6   : > { %v741_v23 = vpop.xlane.xlu1 %740 }
 0x3b7   : > { %3173 = vrcp.f32 %v741_v23  ;;  %v3139_v23 = vld [vmem:[%s4012_s3 + $0x3] ss:$0 sm:$0xff] }
 0x3bd   : > { %v3174_v24 = vpop.eup %3173 }
 0x3be   : > { %v743_v25 = vmul.f32 %v3174_v24, %v3172_v16 }
 0x3c0   : > { %v744_v26 = vpack.c.bf16 %v743_v25, %v743_v25 }
 0x3c2   : > { %2579 = vmatmul.msk.bf16.vlgmr.msra.gmra.mxu1 %vm554_vm1, %v744_v26 }
 0x3c3   : > { %973 = vmatpush.bf16.msra.mxu1 %v964_v6 }
 0x3d2   : > { %2608 = vmatmul.msk.bf16.vlgmr.msrb.gmra.mxu1 %vm471_vm0, %v3422_v5 }
 0x43f   : > { %v761_v31 = vpop.f32.mrf.mxu1 }
 0x440   : > { %v765_v32 = vpack.c.bf16 %v761_v31, %v761_v31 }
 0x442   : > { %2581 = vmatmul.msk.bf16.vlgmr.msra.gmra.mxu2 %vm554_vm1, %v765_v32 }
 0x443   : > { %1005 = vmatpush.bf16.msra.mxu2 %v3027_v1 }
 0x447   : > { %v763_v33 = vpop.f32.mrf.mxu1  ;;  %1006 = vmatpush.bf16.msra.mxu2 %v3026_v2 }
 0x44f   : > { %v866_v35 = vpop.f32.mrf.mxu1 }
 0x450   : > { %v867_v37 = vadd.f32 %v3136_v34, %v866_v35 }
 0x452   : > { %v903_v38 = vpack.c.bf16 %v867_v37, %v867_v37  ;;  %2621 = vmatmul.msk.bf16.vlgmr.msrb.gmra.mxu2 %vm471_vm0, %v3422_v5 }
 0x454   : > { %v908_v40 = vsel %vm554_vm1, %v903_v38, 0  ;;  %v3140_v38 = vld [vmem:[%s4012_s3 + $0xb] ss:$0 sm:$0xff] }
 0x455   : > { %917 = vmatpush.bf16.xpose.msrb.mxu3 %v908_v40 }
 0x457   : > { %v868_v41 = vpop.f32.mrf.mxu1 }
 0x45c   : > { %2622 = vmatmul.msk.bf16.vlgmr.msrb.gmra.mxu3 %vm554_vm1, %v902_v42 }
 0x45d   : > { %1037 = vmatpush.bf16.msra.mxu3 %v3029_v52 }
 0x461   : > { %1038 = vmatpush.bf16.msra.mxu3 %v3028_v0 }
 0x462   : > { %2638 = vmatmul.msk.bf16.vlgmr.msra.gmra.mxu2 %vm471_vm0, %v3422_v5 }
 0x46c   : > { %2651 = vmatmul.msk.bf16.vlgmr.msra.gmra.mxu3 %vm471_vm0, %v3422_v5 }
 0x4c5   : > { %v3536_v43 = vpop.f32.mrf.mxu2 }
 0x4c6   : > { %v803_v29 = vadd.f32 %v3503_v11, %v3536_v43 }
 0x4cd   : > { %v785_v46 = vpop.f32.mrf.mxu2 }
 0x4d5   : > { %v898_v54 = vpop.f32.mrf.mxu2 }
 0x4d6   : > { %v899_v55 = vadd.f32 %v3137_v53, %v898_v54 }
 0x4d8   : > { %v937_v56 = vpack.c.bf16 %v899_v55, %v899_v55 }
 0x4da   : > { %v942_v58 = vsel %vm595_vm2, %v937_v56, 0  ;;  %v3141_v56 = vld [vmem:[%s4017_s8] ss:$0 sm:$0xff] }
 0x4db   : > { %951 = vmatpush.bf16.msra.mxu0 %v942_v58 }
 0x4dd   : > { %v900_v61 = vpop.f32.mrf.mxu2 }
 0x4df   : > { %v919_v47 = vpop.f32.mrf.mxu3  ;;  %1069 = vmatpush.bf16.msrb.mxu0 %v3031_v27  ;;  %v3143_v27 = vld [vmem:[%s4017_s8 + $0x2] ss:$0 sm:$0xff] }
 0x4e0   : > { %v923_v48 = vmul.f32 0.35355338, %v919_v47  ;;  %v2667_v47 = vld [vmem:[%s4013_s4 + $0xc] sm:$0xf] }
 0x4e2   : > { %v924_v49 = vadd.f32 %v3453_v20, %v923_v48  ;;  %v1138_v48 = vsel %vm595_vm2, %v2667_v47, 0 }
 0x4e3   : > { %1070 = vmatpush.bf16.msrb.mxu0 %v3030_v28  ;;  %1147 = vmatpush.bf16.msrb.mxu3 %v1138_v48  ;;  %v3145_v48 = vld [vmem:[%s4017_s8 + $0x3] ss:$0 sm:$0xff] }
 0x4e4   : > { %v925_v50 = vsel %vm554_vm1, %v924_v49, -inf }
 0x4e5   : > { %926 = vmax.xlane.f32.xlu2 %v925_v50  ;;  %v1008_v17 = vpop.f32.mrf.mxu2 }
 0x4e6   : > { %v1009_v25 = vadd.f32 %v3139_v23, %v1008_v17 }
 0x4e7   : > { %v921_v51 = vpop.f32.mrf.mxu3 }
 0x4e8   : > { %v1076_v26 = vpack.c.bf16 %v1009_v25, %v1009_v25  ;;  %v3142_v25 = vld [vmem:[%s4017_s8 + $0x1] ss:$0 sm:$0xff] }
 0x4ed   : > { %v1010_v19 = vpop.f32.mrf.mxu2 }
 0x4ef   : > { %v1040_v13 = vpop.f32.mrf.mxu3 }
 0x4f0   : > { %v1041_v14 = vadd.f32 %v3138_v12, %v1040_v13  ;;  %v3033_v13 = vld [vmem:[%s4014_s5 + $0x8] sm:$0xff] }
 0x4f2   : > { %v1077_v15 = vpack.c.bf16 %v1041_v14, %v1041_v14  ;;  %v3032_v14 = vld [vmem:[%s4014_s5] sm:$0xff] }
 0x4f4   : > { %v1082_v16 = vsel %vm554_vm1, %v1077_v15, 0 }
 0x4f5   : > { %1091 = vmatpush.bf16.xpose.msrb.mxu1 %v1082_v16 }
 0x4f7   : > { %v1042_v18 = vpop.f32.mrf.mxu3 }
 0x558   : > { %v927_v57 = vpop.xlane.xlu2 %926 }
 0x559   : > { %v928_v59 = vsub.f32 %v924_v49, %v927_v57 }
 0x55b   : > { %v929_v60 = vmul.f32 1.442695, %v928_v59 }
 0x55d   : > { %3175 = vpow2.f32 %v929_v60 }
 0x563   : > { %v3176_v62 = vpop.eup %3175 }
 0x564   : > { %v931_v63 = vsel %vm554_vm1, %v3176_v62, 0.0 }
 0x565   : > { %932 = vadd.xlane.f32.xlu2 %v931_v63  ;;  %v3282_v63 = vmov 32.0  }
 0x5d8   : > { %v933_v7 = vpop.xlane.xlu2 %932 }
 0x5d9   : > { %3177 = vrcp.f32 %v933_v7 }
 0x5df   : > { %v3178_v8 = vpop.eup %3177 }
 0x5e0   : > { %v935_v9 = vmul.f32 %v3178_v8, %v3176_v62 }
 0x5e2   : > { %v936_v10 = vpack.c.bf16 %v935_v9, %v935_v9 }
 0x5e4   : > { %2623 = vmatmul.msk.bf16.vlgmr.msra.gmra.mxu0 %vm554_vm1, %v936_v10 }
 0x5e5   : > { %1223 = vmatpush.bf16.msra.mxu0 %v3033_v13 }
 0x5e9   : > { %1224 = vmatpush.bf16.msra.mxu0 %v3032_v14 }
 0x5f4   : > { %2664 = vmatmul.msk.bf16.vlgmr.msrb.gmra.mxu0 %vm471_vm0, %v3422_v5 }
 0x661   : > { %v953_v21 = vpop.f32.mrf.mxu0 }
 0x662   : > { %v957_v22 = vpack.c.bf16 %v953_v21, %v953_v21 }
 0x664   : > { %2625 = vmatmul.msk.bf16.vlgmr.msra.gmra.mxu1 %vm554_vm1, %v957_v22 }
 0x669   : > { %v955_v24 = vpop.f32.mrf.mxu0 }
 0x671   : > { %v1072_v39 = vpop.f32.mrf.mxu0 }
 0x672   : > { %v1073_v11 = vadd.f32 %v3140_v38, %v1072_v39 }
 0x674   : > { %2665 = vmatmul.msk.bf16.vlgmr.msrb.gmra.mxu1 %vm554_vm1, %v1076_v26  ;;  %v1111_v40 = vpack.c.bf16 %v1073_v11, %v1073_v11 }
 0x676   : > { %v1116_v41 = vsel %vm595_vm2, %v1111_v40, 0 }
 0x677   : > { %1125 = vmatpush.bf16.msrb.mxu2 %v1116_v41 }
 0x679   : > { %v1074_v5 = vpop.f32.mrf.mxu0 }
 0x6e1   : > { %v975_v30 = vpop.f32.mrf.mxu1 }
 0x6e2   : > { %v979_v31 = vadd.f32 %v975_v30, %v803_v29 }
 0x6e9   : > { %v977_v32 = vpop.f32.mrf.mxu1 }
 0x6ea   : > { %v3037_v32 = vld [vmem:[%s4016_s7 + $0x18] sm:$0xff] }
 0x6eb   : > { %1282 = vmatpush.bf16.msra.mxu1 %v3037_v32 }
 0x6f1   : > { %v1093_v33 = vpop.f32.mrf.mxu1 }
 0x6f2   : > { %v1097_v34 = vmul.f32 0.35355338, %v1093_v33  ;;  %v3036_v33 = vld [vmem:[%s4016_s7 + $0x10] sm:$0xff] }
 0x6f3   : > { %1283 = vmatpush.bf16.msra.mxu1 %v3036_v33 }
 0x6f4   : > { %v1098_v35 = vadd.f32 %v3453_v20, %v1097_v34  ;;  %v3035_v34 = vld [vmem:[%s4016_s7 + $0x8] sm:$0xff] }
 0x6f6   : > { %v1099_v36 = vsel %vm554_vm1, %v1098_v35, -inf }
 0x6f7   : > { %1100 = vmax.xlane.f32.xlu0 %v1099_v36  ;;  %1284 = vmatpush.bf16.msra.mxu1 %v3035_v34  ;;  %v3144_v36 = vld [vmem:[%s4015_s6] ss:$0 sm:$0xff]  ;;  %v3149_v34 = vld [vmem:[%s4012_s3 + $0x10] ss:$0 sm:$0xff] }
 0x6f9   : > { %v1095_v37 = vpop.f32.mrf.mxu1 }
 0x76a   : > { %v1101_v42 = vpop.xlane.xlu0 %1100 }
 0x76b   : > { %v1102_v43 = vsub.f32 %v1098_v35, %v1101_v42  ;;  %v3034_v35 = vld [vmem:[%s4016_s7] sm:$0xff] }
 0x76c   : > { %1285 = vmatpush.bf16.msra.mxu1 %v3034_v35 }
 0x76d   : > { %v1103_v44 = vmul.f32 1.442695, %v1102_v43 }
 0x76f   : > { %3179 = vpow2.f32 %v1103_v44 }
 0x775   : > { %v3180_v45 = vpop.eup %3179 }
 0x776   : > { %v1105_v46 = vsel %vm554_vm1, %v3180_v45, 0.0 }
 0x777   : > { %1106 = vadd.xlane.f32.xlu1 %v1105_v46 }
 0x7ea   : > { %v1107_v49 = vpop.xlane.xlu1 %1106 }
 0x7eb   : > { %3181 = vrcp.f32 %v1107_v49 }
 0x7ec   : > { %3183 = vrcp.f32 %v3282_v63  ;;  %v3040_v63 = vld [vmem:[%s4011_s2 + $0x100] sm:$0xff] }
 0x7f1   : > { %v3182_v50 = vpop.eup %3181 }
 0x7f2   : > { %v1109_v51 = vmul.f32 %v3182_v50, %v3180_v45  ;;  %v3184_v0 = vpop.eup %3183 }
 0x7f3   : > { %v1164_v1 = vmul.f32 32.0, %v3184_v0  ;;  %vm1168_vm3 = vweird.f32 %v3184_v0 }
 0x7f4   : > { %v1110_v52 = vpack.c.bf16 %v1109_v51, %v1109_v51 }
 0x7f5   : > { %v1165_v2 = vsub.f32 1.0, %v1164_v1 }
 0x7f6   : > { %2666 = vmatmul.msk.bf16.vlgmr.msrb.gmra.mxu2 %vm554_vm1, %v1110_v52 }
 0x7f7   : > { %v1166_v3 = vmul.f32 %v3184_v0, %v1165_v2  ;;  %v3045_v2 = vld [vmem:[%s4011_s2 + $0xd8] sm:$0xff] }
 0x7f9   : > { %v1167_v6 = vadd.f32 %v3184_v0, %v1166_v3  ;;  %v3047_v3 = vld [vmem:[%s4011_s2 + $0x118] sm:$0xff] }
 0x7fb   : > { %v3611_v7 = vsel %vm1168_vm3, %v3184_v0, %v1167_v6  ;;  %v3042_v0 = vld [vmem:[%s4011_s2 + $0x140] sm:$0xff] }
 0x879   : > { %v1127_v53 = vpop.f32.mrf.mxu2 }
 0x87a   : > { %v1131_v54 = vpack.c.bf16 %v1127_v53, %v1127_v53 }
 0x87c   : > { %2668 = vmatmul.msk.bf16.vlgmr.msrb.gmra.mxu3 %vm554_vm1, %v1131_v54 }
 0x881   : > { %v1129_v55 = vpop.f32.mrf.mxu2 }
 0x8ff   : > { %v1149_v57 = vpop.f32.mrf.mxu3 }
 0x900   : > { %v1153_v58 = vadd.f32 %v1149_v57, %v979_v31 }
 0x902   : > { %v1156_v59 = vadd.f32 %v3141_v56, %v1153_v58 }
 0x904   : > { %v1157_v60 = vadd.f32 %v1156_v59, %v3418_v4  ;;  %v3039_v59 = vld [vmem:[%s4011_s2 + $0xc8] sm:$0xff] }
 0x905   : > { %1350 = vmatpush.bf16.msra.mxu2 %v3039_v59 }
 0x906   : > { %v1160_v61 = vsel %vm471_vm0, %v1157_v60, 0.0 }
 0x907   : > { %1161 = vadd.xlane.f32.xlu2 %v1160_v61  ;;  %v1151_v62 = vpop.f32.mrf.mxu3  ;;  %v3043_v61 = vld [vmem:[%s4011_s2 + $0x148] sm:$0xff] }
 0x908   : > { %1414 = vmatpush.bf16.msrb.mxu0 %v3043_v61  ;;  %v3038_v62 = vld [vmem:[%s4011_s2 + $0xc0] sm:$0xff] }
 0x909   : > { %1351 = vmatpush.bf16.msra.mxu2 %v3038_v62 }
 0x90c   : > { %1415 = vmatpush.bf16.msrb.mxu0 %v3042_v0 }
 0x97a   : > { %v1162_v8 = vpop.xlane.xlu2 %1161 }
 0x97b   : > { %v1170_v9 = vmul.f32 %v3611_v7, %v1162_v8  ;;  %v3044_v8 = vld [vmem:[%s4011_s2 + $0xd0] sm:$0xff] }
 0x97d   : > { %v1171_v10 = vsub.f32 %v1157_v60, %v1170_v9  ;;  %v3041_v60 = vld [vmem:[%s4011_s2 + $0x108] sm:$0xff]  ;;  %v3046_v9 = vld [vmem:[%s4011_s2 + $0x110] sm:$0xff] }
 0x97e   : > { %1382 = vmatpush.bf16.msra.mxu3 %v3041_v60 }
 0x97f   : > { %v1172_v12 = vmul.f32 %v1171_v10, %v1171_v10 }
 0x981   : > { %v1173_v4 = vsel %vm471_vm0, %v1172_v12, 0.0 }
 0x982   : > { %1174 = vadd.xlane.f32.xlu0 %v1173_v4  ;;  %1383 = vmatpush.bf16.msra.mxu3 %v3040_v63 }
 0x986   : > { %1504 = vmatpush.bf16.msrb.mxu3 %v3045_v2 }
 0x98a   : > { %1505 = vmatpush.bf16.msrb.mxu3 %v3044_v8  ;;  %v3051_v8 = vld [vmem:[%s4011_s2 + $0xe8] sm:$0xff] }
 0x9f5   : > { %v1175_v15 = vpop.xlane.xlu0 %1174 }
 0x9f6   : > { %v1176_v16 = vmul.f32 %v1175_v15, %v3611_v7 }
 0x9f8   : > { %v1177_v17 = vadd.f32 1e-05, %v1176_v16 }
 0x9fa   : > { %3185 = vrsqrt.f32 %v1177_v17  ;;  %vm1184_vm5 = vweird.f32 %v1177_v17 }
 0xa00   : > { %v3186_v18 = vpop.eup %3185 }
 0xa01   : > { %v1179_v19 = vmul.f32 %v3186_v18, %v1177_v17  ;;  %vm1185_vm4 = vweird.f32 %v3186_v18  ;;  %v3146_v17 = vld [vmem:[%s4017_s8 + $0x4] ss:$0 sm:$0xff] }
 0xa02   : > { %vm1186_vm6 = vmor %vm1184_vm5, %vm1185_vm4 }
 0xa03   : > { %v1180_v21 = vmul.f32 %v3186_v18, %v1179_v19  ;;  %v3147_v19 = vld [vmem:[%s4017_s8 + $0x5] ss:$0 sm:$0xff] }
 0xa05   : > { %v1181_v22 = vmul.f32 0.5, %v1180_v21 }
 0xa07   : > { %v1182_v23 = vsub.f32 1.5, %v1181_v22 }
 0xa09   : > { %v1183_v24 = vmul.f32 %v3186_v18, %v1182_v23 }
 0xa0b   : > { %v1187_v26 = vsel %vm1186_vm6, %v3186_v18, %v1183_v24 }
 0xa0c   : > { %v1188_v28 = vmul.f32 %v1187_v26, %v1171_v10 }
 0xa0e   : > { %v1190_v29 = vmul.f32 %v3142_v25, %v1188_v28  ;;  %v3148_v25 = vld [vmem:[%s4012_s3 + $0x18] ss:$0 sm:$0xff]  ;;  %v3150_v28 = vld [vmem:[%s4012_s3 + $0x14] ss:$0 sm:$0xff] }
 0xa10   : > { %v1192_v30 = vadd.f32 %v3143_v27, %v1190_v29 }
 0xa12   : > { %v1193_v31 = vpack.c.bf16 %v1192_v30, %v1192_v30 }
 0xa14   : > { %2677 = vmatmul.msk.bf16.vlgmr.msra.gmra.mxu0 %vm471_vm0, %v1193_v31 }
 0xa15   : > { %1536 = vmatpush.bf16.msra.mxu0 %v3047_v3 }
 0xa19   : > { %1537 = vmatpush.bf16.msra.mxu0 %v3046_v9 }
 0xa91   : > { %v1226_v37 = vpop.f32.mrf.mxu0 }
 0xa92   : > { %v1227_v38 = vadd.f32 %v3144_v36, %v1226_v37  ;;  %v3049_v37 = vld [vmem:[%s4011_s2 + $0x158] sm:$0xff] }
 0xa94   : > { %v1231_v39 = vmul.f32 0.044715, %v1227_v38  ;;  %v1230_v44 = vmul.f32 0.5, %v1227_v38 }
 0xa96   : > { %v1232_v11 = vmul.f32 %v1231_v39, %v1227_v38 }
 0xa98   : > { %v1233_v40 = vmul.f32 %v1232_v11, %v1227_v38  ;;  %v3048_v11 = vld [vmem:[%s4011_s2 + $0x150] sm:$0xff] }
 0xa99   : > { %v1228_v41 = vpop.f32.mrf.mxu0 }
 0xa9a   : > { %v1234_v5 = vadd.f32 %v1233_v40, %v1227_v38 }
 0xa9c   : > { %v1235_v42 = vmul.f32 0.7978846, %v1234_v5  ;;  %v3151_v5 = vld [vmem:[%s4012_s3 + $0x15] ss:$0 sm:$0xff] }
 0xa9e   : > { %3187 = vtanh.f32 %v1235_v42 }
 0xaa4   : > { %v3188_v43 = vpop.eup %3187 }
 0xaa5   : > { %v1237_v45 = vadd.f32 1.0, %v3188_v43 }
 0xaa7   : > { %v1238_v46 = vmul.f32 %v1237_v45, %v1230_v44 }
 0xaa9   : > { %v1239_v47 = vpack.c.bf16 %v1238_v46, %v1238_v46 }
 0xaab   : > { %2694 = vmatmul.msk.bf16.vlgmr.msra.gmra.mxu1 %vm1274_vm7, %v1239_v47 }
 0xb28   : > { %v1287_v49 = vpop.f32.mrf.mxu1 }
 0xb29   : > { %v1288_v50 = vadd.f32 %v3145_v48, %v1287_v49 }
 0xb2b   : > { %v1291_v51 = vadd.f32 %v1288_v50, %v1192_v30 }
 0xb2d   : > { %v1294_v52 = vsel %vm471_vm0, %v1291_v51, 0.0 }
 0xb2e   : > { %1295 = vadd.xlane.f32.xlu1 %v1294_v52 }
 0xb30   : > { %v1289_v53 = vpop.f32.mrf.mxu1 }
 0xba1   : > { %v1296_v54 = vpop.xlane.xlu1 %1295 }
 0xba2   : > { %v1297_v55 = vmul.f32 %v1296_v54, %v3611_v7 }
 0xba4   : > { %v1298_v56 = vsub.f32 %v1291_v51, %v1297_v55  ;;  %v3153_v55 = vld [vmem:[%s4012_s3 + $0x19] ss:$0 sm:$0xff] }
 0xba6   : > { %v1299_v57 = vmul.f32 %v1298_v56, %v1298_v56 }
 0xba8   : > { %v1300_v58 = vsel %vm471_vm0, %v1299_v57, 0.0 }
 0xba9   : > { %1301 = vadd.xlane.f32.xlu2 %v1300_v58 }
 0xc1c   : > { %v1302_v1 = vpop.xlane.xlu2 %1301 }
 0xc1d   : > { %v1303_v6 = vmul.f32 %v1302_v1, %v3611_v7 }
 0xc1f   : > { %v1304_v10 = vadd.f32 1e-05, %v1303_v6 }
 0xc21   : > { %3189 = vrsqrt.f32 %v1304_v10  ;;  %vm1311_vm9 = vweird.f32 %v1304_v10 }
 0xc27   : > { %v3190_v12 = vpop.eup %3189 }
 0xc28   : > { %v1306_v4 = vmul.f32 %v3190_v12, %v1304_v10  ;;  %vm1312_vm8 = vweird.f32 %v3190_v12  ;;  %v3050_v10 = vld [vmem:[%s4011_s2 + $0xe0] sm:$0xff] }
 0xc29   : > { %vm1313_vm10 = vmor %vm1311_vm9, %vm1312_vm8 }
 0xc2a   : > { %v1307_v13 = vmul.f32 %v3190_v12, %v1306_v4 }
 0xc2c   : > { %v1308_v14 = vmul.f32 0.5, %v1307_v13 }
 0xc2e   : > { %v1309_v15 = vsub.f32 1.5, %v1308_v14  ;;  %v2739_v14 = vld [vmem:[%s4013_s4 + $0x10] sm:$0xf] }
 0xc30   : > { %v1310_v16 = vmul.f32 %v3190_v12, %v1309_v15  ;;  %v1656_v15 = vsel %vm595_vm2, %v2739_v14, 0 }
 0xc32   : > { %v1314_v18 = vsel %vm1313_vm10, %v3190_v12, %v1310_v16  ;;  %v3152_v12 = vld [vmem:[%s4012_s3 + $0x11] ss:$0 sm:$0xff] }
 0xc33   : > { %v1315_v21 = vmul.f32 %v1314_v18, %v1298_v56 }
 0xc35   : > { %v1317_v22 = vmul.f32 %v3146_v17, %v1315_v21 }
 0xc37   : > { %v3688_v23 = vadd.f32 %v3147_v19, %v1317_v22 }
 0xc39   : > { %v3692_v24 = vpack.c.bf16 %v3688_v23, %v3688_v23 }
 0xc3b   : > { %2708 = vmatmul.msk.bf16.vlgmr.msra.gmra.mxu2 %vm471_vm0, %v3692_v24  ;;  %2722 = vmatmul.msk.bf16.vlgmr.msra.gmra.mxu3 %vm471_vm0, %v3692_v24 }
 0xc3c   : > { %2736 = vmatmul.msk.bf16.vlgmr.msrb.gmra.mxu0 %vm471_vm0, %v3692_v24 }
 0xc4b   : > { %2753 = vmatmul.msk.bf16.vlgmr.msrb.gmra.mxu3 %vm471_vm0, %v3692_v24 }
 0xc4c   : > { %2767 = vmatmul.msk.bf16.vlgmr.msra.gmra.mxu0 %vm471_vm0, %v3692_v24 }
 0xcb9   : > { %v1417_v26 = vpop.f32.mrf.mxu0 }
 0xcba   : > { %v1418_v27 = vadd.f32 %v3148_v25, %v1417_v26 }
 0xcbc   : > { %v1456_v29 = vpack.c.bf16 %v1418_v27, %v1418_v27 }
 0xcbe   : > { %v1461_v30 = vsel %vm595_vm2, %v1456_v29, 0  ;;  %v1353_v31 = vpop.f32.mrf.mxu2  ;;  %v1385_v32 = vpop.f32.mrf.mxu3 }
 0xcbf   : > { %v1386_v33 = vadd.f32 %v3150_v28, %v1385_v32  ;;  %1470 = vmatpush.bf16.msrb.mxu2 %v1461_v30  ;;  %v1354_v39 = vadd.f32 %v3149_v34, %v1353_v31 }
 0xcc1   : > { %v1422_v35 = vpack.c.bf16 %v1386_v33, %v1386_v33  ;;  %v1419_v36 = vpop.f32.mrf.mxu0  ;;  %v1421_v42 = vpack.c.bf16 %v1354_v39, %v1354_v39 }
 0xcc2   : > { %v3053_v36 = vld [vmem:[%s4011_s2 + $0x128] sm:$0xff] }
 0xcc3   : > { %v1427_v38 = vsel %vm554_vm1, %v1422_v35, 0 }
 0xcc4   : > { %1436 = vmatpush.bf16.xpose.msrb.mxu1 %v1427_v38 }
 0xcc6   : > { %v1355_v40 = vpop.f32.mrf.mxu2  ;;  %v1387_v41 = vpop.f32.mrf.mxu3 }
 0xcc7   : > { %v2784_v41 = vld [vmem:[%s4013_s4 + $0x14] sm:$0xf] }
 0xcc9   : > { %v1539_v43 = vpop.f32.mrf.mxu0 }
 0xcca   : > { %v1540_v44 = vadd.f32 %v3151_v5, %v1539_v43  ;;  %v1637_v5 = vsel %vm595_vm2, %v2784_v41, 0  ;;  %v3054_v43 = vld [vmem:[%s4011_s2 + $0x160] sm:$0xff] }
 0xccb   : > { %2737 = vmatmul.msk.bf16.vlgmr.msrb.gmra.mxu1 %vm554_vm1, %v1421_v42  ;;  %1646 = vmatpush.bf16.msrb.mxu0 %v1637_v5  ;;  %v3055_v42 = vld [vmem:[%s4011_s2 + $0x168] sm:$0xff] }
 0xccc   : > { %1568 = vmatpush.bf16.msra.mxu1 %v3049_v37  ;;  %v1576_v45 = vpack.c.bf16 %v1540_v44, %v1540_v44  ;;  %v3052_v37 = vld [vmem:[%s4011_s2 + $0x120] sm:$0xff] }
 0xcce   : > { %v1581_v46 = vsel %vm554_vm1, %v1576_v45, 0  ;;  %v1507_v47 = vpop.f32.mrf.mxu3  ;;  %v3057_v45 = vld [vmem:[%s4011_s2 + $0xf8] sm:$0xff] }
 0xccf   : > { %1590 = vmatpush.bf16.xpose.msra.mxu2 %v1581_v46  ;;  %v1508_v4 = vadd.f32 %v3152_v12, %v1507_v47  ;;  %1760 = vmatpush.bf16.msra.mxu0 %v3055_v42  ;;  %v3056_v47 = vld [vmem:[%s4011_s2 + $0xf0] sm:$0xff] }
 0xcd0   : > { %1569 = vmatpush.bf16.msra.mxu1 %v3048_v11 }
 0xcd1   : > { %v1541_v48 = vpop.f32.mrf.mxu0  ;;  %v1575_v13 = vpack.c.bf16 %v1508_v4, %v1508_v4 }
 0xcd3   : > { %1761 = vmatpush.bf16.msra.mxu0 %v3054_v43 }
 0xcd4   : > { %1665 = vmatpush.bf16.msrb.mxu1 %v1656_v15  ;;  %v3158_v15 = vld [vmem:[%s4012_s3 + $0x17] ss:$0 sm:$0xff] }
 0xcd6   : > { %v1509_v49 = vpop.f32.mrf.mxu3 }
 0xcd7   : > { %v3155_v49 = vld [vmem:[%s4012_s3 + $0x16] ss:$0 sm:$0xff] }
 0xcdb   : > { %2781 = vmatmul.msk.bf16.vlgmr.msra.gmra.mxu1 %vm471_vm0, %v3692_v24 }
 0xd48   : > { %v1438_v50 = vpop.f32.mrf.mxu1 }
 0xd49   : > { %v1442_v51 = vmul.f32 0.35355338, %v1438_v50 }
 0xd4b   : > { %v1443_v52 = vadd.f32 %v3453_v20, %v1442_v51 }
 0xd4d   : > { %v1444_v53 = vsel %vm554_vm1, %v1443_v52, -inf }
 0xd4e   : > { %1445 = vmax.xlane.f32.xlu0 %v1444_v53 }
 0xd50   : > { %v1440_v54 = vpop.f32.mrf.mxu1 }
 0xd51   : > { %v3059_v54 = vld [vmem:[%s4011_s2 + $0x138] sm:$0xff] }
 0xd58   : > { %v1571_v56 = vpop.f32.mrf.mxu1 }
 0xd59   : > { %v1572_v57 = vadd.f32 %v3153_v55, %v1571_v56 }
 0xd5b   : > { %v1610_v58 = vpack.c.bf16 %v1572_v57, %v1572_v57  ;;  %v3058_v57 = vld [vmem:[%s4011_s2 + $0x130] sm:$0xff] }
 0xd5d   : > { %v1615_v59 = vsel %vm595_vm2, %v1610_v58, 0 }
 0xd5e   : > { %1624 = vmatpush.bf16.msra.mxu3 %v1615_v59 }
 0xd60   : > { %v1573_v60 = vpop.f32.mrf.mxu1 }
 0xd62   : > { %1728 = vmatpush.bf16.msrb.mxu3 %v3053_v36 }
 0xd66   : > { %1729 = vmatpush.bf16.msrb.mxu3 %v3052_v37 }
 0xdc1   : > { %v1446_v61 = vpop.xlane.xlu0 %1445 }
 0xdc2   : > { %v1447_v62 = vsub.f32 %v1443_v52, %v1446_v61  ;;  %v3154_v52 = vld [vmem:[%s4012_s3 + $0x12] ss:$0 sm:$0xff] }
 0xdc4   : > { %v1448_v63 = vmul.f32 1.442695, %v1447_v62  ;;  %v3156_v62 = vld [vmem:[%s4012_s3 + $0x1a] ss:$0 sm:$0xff] }
 0xdc6   : > { %3191 = vpow2.f32 %v1448_v63  ;;  %v2831_v63 = vld [vmem:[%s4013_s4 + $0x18] sm:$0xf] }
 0xdcc   : > { %v3192_v0 = vpop.eup %3191 }
 0xdcd   : > { %v1450_v1 = vsel %vm554_vm1, %v3192_v0, 0.0 }
 0xdce   : > { %1451 = vadd.xlane.f32.xlu1 %v1450_v1 }
 0xe41   : > { %v1452_v2 = vpop.xlane.xlu1 %1451 }
 0xe42   : > { %3193 = vrcp.f32 %v1452_v2 }
 0xe48   : > { %v3194_v3 = vpop.eup %3193 }
 0xe49   : > { %v1454_v6 = vmul.f32 %v3194_v3, %v3192_v0  ;;  %v1829_v0 = vsel %vm595_vm2, %v2831_v63, 0 }
 0xe4b   : > { %v1455_v9 = vpack.c.bf16 %v1454_v6, %v1454_v6 }
 0xe4d   : > { %2738 = vmatmul.msk.bf16.vlgmr.msrb.gmra.mxu2 %vm554_vm1, %v1455_v9 }
 0xe4e   : > { %1696 = vmatpush.bf16.msrb.mxu2 %v3051_v8 }
 0xe52   : > { %1697 = vmatpush.bf16.msrb.mxu2 %v3050_v10 }
 0xe5d   : > { %2782 = vmatmul.msk.bf16.vlgmr.msra.gmra.mxu2 %vm554_vm1, %v1575_v13 }
 0xe6d   : > { %2800 = vmatmul.msk.bf16.vlgmr.msrb.gmra.mxu2 %vm471_vm0, %v3692_v24 }
 0xed0   : > { %v1472_v16 = vpop.f32.mrf.mxu2 }
 0xed1   : > { %v1476_v17 = vpack.c.bf16 %v1472_v16, %v1472_v16 }
 0xed3   : > { %2786 = vmatmul.msk.bf16.vlgmr.msrb.gmra.mxu1 %vm554_vm1, %v1476_v17 }
 0xed8   : > { %v1474_v18 = vpop.f32.mrf.mxu2 }
 0xee0   : > { %v1592_v19 = vpop.f32.mrf.mxu2 }
 0xee1   : > { %v1596_v21 = vmul.f32 0.35355338, %v1592_v19 }
 0xee3   : > { %v1597_v22 = vadd.f32 %v3453_v20, %v1596_v21 }
 0xee5   : > { %v1598_v25 = vsel %vm554_vm1, %v1597_v22, -inf }
 0xee6   : > { %1599 = vmax.xlane.f32.xlu2 %v1598_v25 }
 0xee8   : > { %v1594_v26 = vpop.f32.mrf.mxu2 }
 0xef0   : > { %v1699_v27 = vpop.f32.mrf.mxu2 }
 0xef1   : > { %v1700_v56 = vadd.f32 %v3154_v52, %v1699_v27 }
 0xef3   : > { %v1767_v59 = vpack.c.bf16 %v1700_v56, %v1700_v56 }
 0xef8   : > { %v1701_v28 = vpop.f32.mrf.mxu2 }
 0xf50   : > { %v3755_v29 = vpop.f32.mrf.mxu1 }
 0xf58   : > { %v1669_v30 = vpop.f32.mrf.mxu1 }
 0xf59   : > { %v1600_v31 = vpop.xlane.xlu2 %1599  ;;  %v3061_v30 = vld [vmem:[%s4011_s2 + $0x178] sm:$0xff] }
 0xf5a   : > { %v1601_v32 = vsub.f32 %v1597_v22, %v1600_v31  ;;  %v3060_v31 = vld [vmem:[%s4011_s2 + $0x170] sm:$0xff] }
 0xf5c   : > { %v1602_v33 = vmul.f32 1.442695, %v1601_v32 }
 0xf5e   : > { %3195 = vpow2.f32 %v1602_v33 }
 0xf64   : > { %v3196_v34 = vpop.eup %3195 }
 0xf65   : > { %v1604_v35 = vsel %vm554_vm1, %v3196_v34, 0.0 }
 0xf66   : > { %1605 = vadd.xlane.f32.xlu0 %v1604_v35 }
 0xfd9   : > { %v1606_v38 = vpop.xlane.xlu0 %1605 }
 0xfda   : > { %3197 = vrcp.f32 %v1606_v38 }
 0xfe0   : > { %v3198_v39 = vpop.eup %3197 }
 0xfe1   : > { %v1608_v11 = vmul.f32 %v3198_v39, %v3196_v34  ;;  %v3157_v39 = vld [vmem:[%s4012_s3 + $0x13] ss:$0 sm:$0xff] }
 0xfe3   : > { %v1609_v40 = vpack.c.bf16 %v1608_v11, %v1608_v11 }
 0xfe5   : > { %2783 = vmatmul.msk.bf16.vlgmr.msra.gmra.mxu3 %vm554_vm1, %v1609_v40  ;;  %v3159_v40 = vld [vmem:[%s4012_s3 + $0x1b] ss:$0 sm:$0xff] }
 0xfe6   : > { %1838 = vmatpush.bf16.msra.mxu3 %v1829_v0 }
 0xff5   : > { %2814 = vmatmul.msk.bf16.vlgmr.msrb.gmra.mxu3 %vm471_vm0, %v3692_v24 }
0x1068   : > { %v1626_v44 = vpop.f32.mrf.mxu3 }
0x1069   : > { %v1630_v46 = vpack.c.bf16 %v1626_v44, %v1626_v44 }
0x106b   : > { %2785 = vmatmul.msk.bf16.vlgmr.msrb.gmra.mxu0 %vm554_vm1, %v1630_v46 }
0x106c   : > { %1870 = vmatpush.bf16.msrb.mxu0 %v3057_v45 }
0x1070   : > { %v1628_v48 = vpop.f32.mrf.mxu3  ;;  %1871 = vmatpush.bf16.msrb.mxu0 %v3056_v47 }
0x1078   : > { %v1731_v50 = vpop.f32.mrf.mxu3 }
0x1079   : > { %v1732_v51 = vadd.f32 %v3155_v49, %v1731_v50 }
0x107b   : > { %v1768_v53 = vpack.c.bf16 %v1732_v51, %v1732_v51  ;;  %2828 = vmatmul.msk.bf16.vlgmr.msra.gmra.mxu0 %vm471_vm0, %v3692_v24  ;;  %v3217_v51 = vld [vmem:[%s3439_s15] ss:$0 sm:$0xff] }
0x107d   : > { %v1773_v55 = vsel %vm554_vm1, %v1768_v53, 0 }
0x107e   : > { %1782 = vmatpush.bf16.xpose.msra.mxu1 %v1773_v55 }
0x1080   : > { %v1733_v58 = vpop.f32.mrf.mxu3 }
0x1085   : > { %2829 = vmatmul.msk.bf16.vlgmr.msra.gmra.mxu1 %vm554_vm1, %v1767_v59 }
0x1086   : > { %1902 = vmatpush.bf16.msrb.mxu1 %v3059_v54 }
0x108a   : > { %1903 = vmatpush.bf16.msrb.mxu1 %v3058_v57 }
0x108b   : > { %2846 = vmatmul.msk.bf16.vlgmr.msrb.gmra.mxu0 %vm471_vm0, %v3692_v24 }
0x1095   : > { %2860 = vmatmul.msk.bf16.vlgmr.msrb.gmra.mxu1 %vm471_vm0, %v3692_v24 }
0x10e8   : > { %v1648_v60 = vpop.f32.mrf.mxu0 }
0x10e9   : > { %v1668_v45 = vadd.f32 %v3755_v29, %v1648_v60  ;;  %v2877_v29 = vld [vmem:[%s4013_s4 + $0x1c] sm:$0xf] }
0x10ea   : > { %v2003_v60 = vsel %vm595_vm2, %v2877_v29, 0 }
0x10eb   : > { %2012 = vmatpush.bf16.msra.mxu1 %v2003_v60 }
0x10f0   : > { %v1650_v61 = vpop.f32.mrf.mxu0 }
0x10f8   : > { %v1763_v1 = vpop.f32.mrf.mxu0 }
0x10f9   : > { %v1764_v2 = vadd.f32 %v3156_v62, %v1763_v1 }
0x10fb   : > { %v1802_v3 = vpack.c.bf16 %v1764_v2, %v1764_v2 }
0x10fd   : > { %v1807_v6 = vsel %vm595_vm2, %v1802_v3, 0 }
0x10fe   : > { %1816 = vmatpush.bf16.msra.mxu2 %v1807_v6  ;;  %v3160_v6 = vld [vmem:[%s4017_s8 + $0x8] ss:$0 sm:$0xff] }
0x1100   : > { %v1765_v8 = vpop.f32.mrf.mxu0 }
0x1102   : > { %v1784_v9 = vpop.f32.mrf.mxu1  ;;  %1934 = vmatpush.bf16.msrb.mxu2 %v3061_v30 }
0x1103   : > { %v1788_v10 = vmul.f32 0.35355338, %v1784_v9 }
0x1105   : > { %v1789_v12 = vadd.f32 %v3453_v20, %v1788_v10 }
0x1106   : > { %1935 = vmatpush.bf16.msrb.mxu2 %v3060_v31 }
0x1107   : > { %v1790_v4 = vsel %vm554_vm1, %v1789_v12, -inf }
0x1108   : > { %v1873_v13 = vpop.f32.mrf.mxu0  ;;  %1791 = vmax.xlane.f32.xlu1 %v1790_v4 }
0x1109   : > { %v1874_v11 = vadd.f32 %v3157_v39, %v1873_v13  ;;  %v3067_v39 = vld [vmem:[%s4016_s7 + $0x38] sm:$0xff] }
0x110a   : > { %v1786_v14 = vpop.f32.mrf.mxu1 }
0x110b   : > { %v1941_v5 = vpack.c.bf16 %v1874_v11, %v1874_v11  ;;  %v3066_v11 = vld [vmem:[%s4016_s7 + $0x30] sm:$0xff] }
0x1110   : > { %v1875_v16 = vpop.f32.mrf.mxu0 }
0x1112   : > { %v1905_v17 = vpop.f32.mrf.mxu1 }
0x1113   : > { %v1906_v18 = vadd.f32 %v3158_v15, %v1905_v17 }
0x1115   : > { %v1942_v19 = vpack.c.bf16 %v1906_v18, %v1906_v18 }
0x1117   : > { %v1947_v21 = vsel %vm554_vm1, %v1942_v19, 0  ;;  %v3063_v19 = vld [vmem:[%s4014_s5 + $0x18] sm:$0xff] }
0x1118   : > { %1956 = vmatpush.bf16.xpose.msrb.mxu3 %v1947_v21 }
0x111a   : > { %v1907_v22 = vpop.f32.mrf.mxu1 }
0x117b   : > { %v1792_v25 = vpop.xlane.xlu1 %1791 }
0x117c   : > { %v1793_v26 = vsub.f32 %v1789_v12, %v1792_v25 }
0x117e   : > { %v1794_v20 = vmul.f32 1.442695, %v1793_v26 }
0x1180   : > { %3199 = vpow2.f32 %v1794_v20 }
0x1186   : > { %v3200_v27 = vpop.eup %3199 }
0x1187   : > { %v1796_v28 = vsel %vm554_vm1, %v3200_v27, 0.0 }
0x1188   : > { %1797 = vadd.xlane.f32.xlu2 %v1796_v28 }
0x11fb   : > { %v1798_v32 = vpop.xlane.xlu2 %1797 }
0x11fc   : > { %3201 = vrcp.f32 %v1798_v32  ;;  %v3161_v32 = vld [vmem:[%s4017_s8 + $0x9] ss:$0 sm:$0xff] }
0x1202   : > { %v3202_v33 = vpop.eup %3201 }
0x1203   : > { %v1800_v34 = vmul.f32 %v3202_v33, %v3200_v27 }
0x1205   : > { %v1801_v35 = vpack.c.bf16 %v1800_v34, %v1800_v34  ;;  %v3162_v34 = vld [vmem:[%s4017_s8 + $0xa] ss:$0 sm:$0xff] }
0x1207   : > { %2830 = vmatmul.msk.bf16.vlgmr.msra.gmra.mxu2 %vm554_vm1, %v1801_v35 }
0x1208   : > { %2084 = vmatpush.bf16.msra.mxu2 %v3063_v19  ;;  %v3078_v19 = vld [vmem:[%s4020_s11 + $0x30] sm:$0xff] }
0x1217   : > { %2874 = vmatmul.msk.bf16.vlgmr.msrb.gmra.mxu2 %vm471_vm0, %v3692_v24 }
0x128a   : > { %v1818_v36 = vpop.f32.mrf.mxu2 }
0x128b   : > { %v1822_v37 = vpack.c.bf16 %v1818_v36, %v1818_v36 }
0x128d   : > { %2832 = vmatmul.msk.bf16.vlgmr.msra.gmra.mxu3 %vm554_vm1, %v1822_v37 }
0x128e   : > { %2143 = vmatpush.bf16.msra.mxu3 %v3067_v39  ;;  %v3166_v39 = vld [vmem:[%s4017_s8 + $0xd] ss:$0 sm:$0xff] }
0x1292   : > { %v1820_v38 = vpop.f32.mrf.mxu2  ;;  %2144 = vmatpush.bf16.msra.mxu3 %v3066_v11 }
0x129a   : > { %v1937_v41 = vpop.f32.mrf.mxu2 }
0x129b   : > { %v1938_v42 = vadd.f32 %v3159_v40, %v1937_v41  ;;  %v3065_v40 = vld [vmem:[%s4016_s7 + $0x28] sm:$0xff]  ;;  %v3064_v41 = vld [vmem:[%s4016_s7 + $0x20] sm:$0xff] }
0x129c   : > { %2145 = vmatpush.bf16.msra.mxu3 %v3065_v40 }
0x129d   : > { %v1976_v43 = vpack.c.bf16 %v1938_v42, %v1938_v42  ;;  %2875 = vmatmul.msk.bf16.vlgmr.msrb.gmra.mxu3 %vm554_vm1, %v1941_v5  ;;  %v3163_v5 = vld [vmem:[%s4015_s6 + $0x1] ss:$0 sm:$0xff] }
0x129f   : > { %v1981_v24 = vsel %vm595_vm2, %v1976_v43, 0 }
0x12a0   : > { %1990 = vmatpush.bf16.msra.mxu0 %v1981_v24  ;;  %2146 = vmatpush.bf16.msra.mxu3 %v3064_v41 }
0x12a2   : > { %v1939_v44 = vpop.f32.mrf.mxu2 }
0x1310   : > { %v1840_v46 = vpop.f32.mrf.mxu3 }
0x1311   : > { %v1844_v47 = vadd.f32 %v1840_v46, %v1668_v45 }
0x1318   : > { %v1842_v48 = vpop.f32.mrf.mxu3 }
0x1320   : > { %v1958_v49 = vpop.f32.mrf.mxu3 }
0x1321   : > { %v1962_v50 = vmul.f32 0.35355338, %v1958_v49 }
0x1323   : > { %v1963_v52 = vadd.f32 %v3217_v51, %v1962_v50 }
0x1325   : > { %v1964_v53 = vsel %vm554_vm1, %v1963_v52, -inf }
0x1326   : > { %1965 = vmax.xlane.f32.xlu0 %v1964_v53 }
0x1328   : > { %v1960_v54 = vpop.f32.mrf.mxu3 }
0x1329   : > { %v3164_v54 = vld [vmem:[%s4017_s8 + $0xb] ss:$0 sm:$0xff] }
0x1399   : > { %v1966_v55 = vpop.xlane.xlu0 %1965 }
0x139a   : > { %v1967_v56 = vsub.f32 %v1963_v52, %v1966_v55 }
0x139c   : > { %v1968_v57 = vmul.f32 1.442695, %v1967_v56 }
0x139e   : > { %3203 = vpow2.f32 %v1968_v57 }
0x13a4   : > { %v3204_v58 = vpop.eup %3203 }
0x13a5   : > { %v1970_v59 = vsel %vm554_vm1, %v3204_v58, 0.0 }
0x13a6   : > { %1971 = vadd.xlane.f32.xlu1 %v1970_v59 }
0x1419   : > { %v1972_v61 = vpop.xlane.xlu1 %1971 }
0x141a   : > { %3205 = vrcp.f32 %v1972_v61 }
0x1420   : > { %v3206_v62 = vpop.eup %3205 }
0x1421   : > { %v1974_v63 = vmul.f32 %v3206_v62, %v3204_v58 }
0x1423   : > { %v1975_v0 = vpack.c.bf16 %v1974_v63, %v1974_v63 }
0x1425   : > { %2876 = vmatmul.msk.bf16.vlgmr.msra.gmra.mxu0 %vm554_vm1, %v1975_v0  ;;  %v2934_v0 = vld [vmem:[%s4018_s9 + $0x10] sm:$0xf] }
0x14a2   : > { %v1992_v1 = vpop.f32.mrf.mxu0 }
0x14a3   : > { %v1996_v2 = vpack.c.bf16 %v1992_v1, %v1992_v1  ;;  %v3071_v1 = vld [vmem:[%s4018_s9 + $0x14] sm:$0xf0] }
0x14a5   : > { %2878 = vmatmul.msk.bf16.vlgmr.msra.gmra.mxu1 %vm554_vm1, %v1996_v2  ;;  %v3070_v2 = vld [vmem:[%s4018_s9 + $0x14] sm:$0xf] }
0x14aa   : > { %v1994_v3 = vpop.f32.mrf.mxu0 }
0x14ab   : > { %v2935_v3 = vor.u32 %v3071_v1, %v2934_v0 }
0x14ad   : > { %2221 = vmatpush.bf16.msrb.mxu0 %v2935_v3 }
0x1522   : > { %v2014_v8 = vpop.f32.mrf.mxu1 }
0x1523   : > { %v2018_v9 = vadd.f32 %v2014_v8, %v1844_v47 }
0x1525   : > { %v2022_v10 = vadd.f32 %v3160_v6, %v2018_v9  ;;  %v2936_v6 = vld [vmem:[%s4018_s9 + $0x18] sm:$0xf0]  ;;  %v2926_v9 = vld [vmem:[%s4018_s9] sm:$0xf] }
0x1526   : > { %v2939_v8 = vor.u32 %v3070_v2, %v2936_v6 }
0x1527   : > { %v2023_v12 = vadd.f32 %v2022_v10, %v3688_v23  ;;  %v3062_v23 = vld [vmem:[%s4014_s5 + $0x10] sm:$0xff]  ;;  %v3069_v10 = vld [vmem:[%s4018_s9 + $0x4] sm:$0xf0] }
0x1528   : > { %2085 = vmatpush.bf16.msra.mxu2 %v3062_v23  ;;  %2234 = vmatpush.bf16.msrb.mxu1 %v2939_v8  ;;  %v3086_v23 = vld [vmem:[%s4020_s11 + $0x70] sm:$0xff] }
0x1529   : > { %v2026_v4 = vsel %vm471_vm0, %v2023_v12, 0.0 }
0x152a   : > { %2027 = vadd.xlane.f32.xlu2 %v2026_v4  ;;  %v2016_v13 = vpop.f32.mrf.mxu1  ;;  %v2927_v4 = vor.u32 %v3069_v10, %v2926_v9 }
0x152b   : > { %v2928_v13 = vld [vmem:[%s4018_s9 + $0x8] sm:$0xf0] }
0x152c   : > { %2222 = vmatpush.bf16.msrb.mxu0 %v2927_v4 }
0x159d   : > { %v2028_v14 = vpop.xlane.xlu2 %2027 }
0x159e   : > { %v2029_v15 = vmul.f32 %v2028_v14, %v3611_v7 }
0x15a0   : > { %v2030_v16 = vsub.f32 %v2023_v12, %v2029_v15  ;;  %v3068_v12 = vld [vmem:[%s4018_s9 + $0x4] sm:$0xf]  ;;  %v3079_v15 = vld [vmem:[%s4020_s11 + $0x38] sm:$0xff] }
0x15a1   : > { %v2931_v14 = vor.u32 %v3068_v12, %v2928_v13  ;;  %2374 = vmatpush.bf16.msrb.mxu2 %v3079_v15 }
0x15a2   : > { %v2031_v17 = vmul.f32 %v2030_v16, %v2030_v16 }
0x15a3   : > { %2235 = vmatpush.bf16.msrb.mxu1 %v2931_v14 }
0x15a4   : > { %v2032_v18 = vsel %vm471_vm0, %v2031_v17, 0.0 }
0x15a5   : > { %2033 = vadd.xlane.f32.xlu0 %v2032_v18  ;;  %2375 = vmatpush.bf16.msrb.mxu2 %v3078_v19 }
0x1618   : > { %v2034_v21 = vpop.xlane.xlu0 %2033 }
0x1619   : > { %v2035_v22 = vmul.f32 %v2034_v21, %v3611_v7 }
0x161b   : > { %v2036_v25 = vadd.f32 1e-05, %v2035_v22  ;;  %v3077_v22 = vld [vmem:[%s4020_s11 + $0x28] sm:$0xff] }
0x161c   : > { %2376 = vmatpush.bf16.msrb.mxu2 %v3077_v22 }
0x161d   : > { %3207 = vrsqrt.f32 %v2036_v25  ;;  %vm2043_vm12 = vweird.f32 %v2036_v25 }
0x1623   : > { %v3208_v26 = vpop.eup %3207 }
0x1624   : > { %v2038_v20 = vmul.f32 %v3208_v26, %v2036_v25  ;;  %vm2044_vm11 = vweird.f32 %v3208_v26  ;;  %v3076_v25 = vld [vmem:[%s4020_s11 + $0x20] sm:$0xff] }
0x1625   : > { %vm2045_vm13 = vmor %vm2043_vm12, %vm2044_vm11  ;;  %2377 = vmatpush.bf16.msrb.mxu2 %v3076_v25 }
0x1626   : > { %v2039_v27 = vmul.f32 %v3208_v26, %v2038_v20 }
0x1628   : > { %v2040_v28 = vmul.f32 0.5, %v2039_v27 }
0x162a   : > { %v2041_v30 = vsub.f32 1.5, %v2040_v28  ;;  %v3075_v28 = vld [vmem:[%s4020_s11 + $0x18] sm:$0xff] }
0x162b   : > { %2378 = vmatpush.bf16.msrb.mxu2 %v3075_v28 }
0x162c   : > { %v2042_v31 = vmul.f32 %v3208_v26, %v2041_v30  ;;  %v3083_v30 = vld [vmem:[%s4020_s11 + $0x58] sm:$0xff] }
0x162e   : > { %v2046_v33 = vsel %vm2045_vm13, %v3208_v26, %v2042_v31  ;;  %v3084_v26 = vld [vmem:[%s4020_s11 + $0x60] sm:$0xff] }
0x162f   : > { %v2047_v35 = vmul.f32 %v2046_v33, %v2030_v16  ;;  %v3087_v16 = vld [vmem:[%s4020_s11 + $0x78] sm:$0xff]  ;;  %v3074_v33 = vld [vmem:[%s4020_s11 + $0x10] sm:$0xff] }
0x1630   : > { %2387 = vmatpush.bf16.msrb.mxu3 %v3087_v16  ;;  %2379 = vmatpush.bf16.msrb.mxu2 %v3074_v33 }
0x1631   : > { %v2049_v36 = vmul.f32 %v3161_v32, %v2047_v35 }
0x1633   : > { %v2051_v37 = vadd.f32 %v3162_v34, %v2049_v36  ;;  %v3082_v34 = vld [vmem:[%s4020_s11 + $0x50] sm:$0xff] }
0x1634   : > { %2388 = vmatpush.bf16.msrb.mxu3 %v3086_v23 }
0x1635   : > { %v2052_v38 = vpack.c.bf16 %v2051_v37, %v2051_v37 }
0x1637   : > { %2895 = vmatmul.msk.bf16.vlgmr.msra.gmra.mxu2 %vm471_vm0, %v2052_v38 }
0x16ba   : > { %v2087_v42 = vpop.f32.mrf.mxu2 }
0x16bb   : > { %v2088_v43 = vadd.f32 %v3163_v5, %v2087_v42  ;;  %v3073_v42 = vld [vmem:[%s4020_s11 + $0x8] sm:$0xff] }
0x16bc   : > { %2380 = vmatpush.bf16.msrb.mxu2 %v3073_v42 }
0x16bd   : > { %v2092_v24 = vmul.f32 0.044715, %v2088_v43  ;;  %v2091_v50 = vmul.f32 0.5, %v2088_v43 }
0x16bf   : > { %v2093_v44 = vmul.f32 %v2092_v24, %v2088_v43  ;;  %v3072_v24 = vld [vmem:[%s4020_s11] sm:$0xff] }
0x16c0   : > { %2381 = vmatpush.bf16.msrb.mxu2 %v3072_v24 }
0x16c1   : > { %v2094_v45 = vmul.f32 %v2093_v44, %v2088_v43  ;;  %v3080_v44 = vld [vmem:[%s4020_s11 + $0x40] sm:$0xff] }
0x16c2   : > { %v2089_v46 = vpop.f32.mrf.mxu2 }
0x16c3   : > { %v2095_v47 = vadd.f32 %v2094_v45, %v2088_v43  ;;  %v3081_v43 = vld [vmem:[%s4020_s11 + $0x48] sm:$0xff]  ;;  %v2186_v45 = vld [vmem:[%s4019_s10] sm:$0x3] }
0x16c4   : > { %v2208_v46 = vperm.slane %v2186_v45, 0 }
0x16c5   : > { %v2096_v48 = vmul.f32 0.7978846, %v2095_v47  ;;  %v2209_v47 = vperm.slane %v2186_v45, 1 }
0x16c7   : > { %3209 = vtanh.f32 %v2096_v48 }
0x16cd   : > { %v3210_v49 = vpop.eup %3209 }
0x16ce   : > { %v2098_v51 = vadd.f32 1.0, %v3210_v49 }
0x16d0   : > { %v2099_v52 = vmul.f32 %v2098_v51, %v2091_v50 }
0x16d2   : > { %v2100_v53 = vpack.c.bf16 %v2099_v52, %v2099_v52 }
0x16d4   : > { %2921 = vmatmul.msk.bf16.vlgmr.msra.gmra.mxu3 %vm1274_vm7, %v2100_v53 }
0x1757   : > { %v2148_v55 = vpop.f32.mrf.mxu3 }
0x1758   : > { %v2149_v56 = vadd.f32 %v3164_v54, %v2148_v55 }
0x175a   : > { %v2152_v57 = vadd.f32 %v2149_v56, %v2051_v37  ;;  %v3165_v37 = vld [vmem:[%s4017_s8 + $0xc] ss:$0 sm:$0xff] }
0x175c   : > { %v2155_v58 = vsel %vm471_vm0, %v2152_v57, 0.0 }
0x175d   : > { %2156 = vadd.xlane.f32.xlu1 %v2155_v58  ;;  %v2277_v58 = vld [vmem:[%s4021_s12] sm:$0x1] }
0x175f   : > { %v2150_v59 = vpop.f32.mrf.mxu3 }
0x17d0   : > { %v2157_v29 = vpop.xlane.xlu1 %2156 }
0x17d1   : > { %v2158_v60 = vmul.f32 %v2157_v29, %v3611_v7 }
0x17d3   : > { %v2159_v61 = vsub.f32 %v2152_v57, %v2158_v60 }
0x17d5   : > { %v2160_v62 = vmul.f32 %v2159_v61, %v2159_v61 }
0x17d7   : > { %v2161_v63 = vsel %vm471_vm0, %v2160_v62, 0.0 }
0x17d8   : > { %2162 = vadd.xlane.f32.xlu2 %v2161_v63 }
0x184b   : > { %v2163_v17 = vpop.xlane.xlu2 %2162 }
0x184c   : > { %v2164_v18 = vmul.f32 %v2163_v17, %v3611_v7  ;;  %v3085_v7 = vld [vmem:[%s4020_s11 + $0x68] sm:$0xff] }
0x184d   : > { %2389 = vmatpush.bf16.msrb.mxu3 %v3085_v7 }
0x184e   : > { %v2165_v21 = vadd.f32 1e-05, %v2164_v18 }
0x1850   : > { %3211 = vrsqrt.f32 %v2165_v21  ;;  %vm2172_vm15 = vweird.f32 %v2165_v21 }
0x1851   : > { %2390 = vmatpush.bf16.msrb.mxu3 %v3084_v26 }
0x1855   : > { %2391 = vmatpush.bf16.msrb.mxu3 %v3083_v30 }
0x1856   : > { %v3212_v20 = vpop.eup %3211 }
0x1857   : > { %v2167_v27 = vmul.f32 %v3212_v20, %v2165_v21  ;;  %vm2173_vm14 = vweird.f32 %v3212_v20 }
0x1858   : > { %vm2174_vm1 = vmor %vm2172_vm15, %vm2173_vm14 }
0x1859   : > { %v2168_v31 = vmul.f32 %v3212_v20, %v2167_v27  ;;  %2392 = vmatpush.bf16.msrb.mxu3 %v3082_v34 }
0x185b   : > { %v2169_v32 = vmul.f32 0.5, %v2168_v31 }
0x185d   : > { %v2170_v35 = vsub.f32 1.5, %v2169_v32  ;;  %2393 = vmatpush.bf16.msrb.mxu3 %v3081_v43 }
0x185f   : > { %v2171_v36 = vmul.f32 %v3212_v20, %v2170_v35 }
0x1861   : > { %v2175_v38 = vsel %vm2174_vm1, %v3212_v20, %v2171_v36  ;;  %2394 = vmatpush.bf16.msrb.mxu3 %v3080_v44 }
0x1862   : > { %v2176_v11 = vmul.f32 %v2175_v38, %v2159_v61 }
0x1864   : > { %v2178_v40 = vmul.f32 %v3165_v37, %v2176_v11 }
0x1866   : > { %v2180_v41 = vadd.f32 %v3166_v39, %v2178_v40 }
0x1868   : > { %v2181_v5 = vpack.c.bf16 %v2180_v41, %v2180_v41 }
0x186a   : > { %2940 = vmatmul.msk.bf16.vlgmr.msrb.gmra.mxu0 %vm471_vm0, %v2181_v5  ;;  %2941 = vmatmul.msk.bf16.vlgmr.msrb.gmra.mxu1 %vm471_vm0, %v2181_v5 }
0x18e7   : > { %v2224_v48 = vpop.f32.mrf.mxu0  ;;  %v2237_v49 = vpop.f32.mrf.mxu1 }
0x18e8   : > { %v2225_v50 = vadd.f32 %v2224_v48, %v2208_v46  ;;  %v2238_v51 = vadd.f32 %v2237_v49, %v2209_v47 }
0x18ea   : > { %v2241_v52 = vmax.f32 %v2225_v50, 0.0  ;;  %v2242_v53 = vmax.f32 %v2238_v51, 0.0 }
0x18ec   : > { %v2243_v54 = vpack.c.bf16 %v2241_v52, %v2241_v52  ;;  %v2244_v55 = vpack.c.bf16 %v2242_v53, %v2242_v53 }
0x18ee   : > { %2382 = vmatmul.bf16.vlgmr.msrb.gmra.mxu2 %v2243_v54  ;;  %2395 = vmatmul.bf16.vlgmr.msrb.gmra.mxu3 %v2244_v55 }
0x18ef   : > { %v2226_v56 = vpop.f32.mrf.mxu0  ;;  %v2239_v57 = vpop.f32.mrf.mxu1 }
0x1971   : > { %v2383_v59 = vpop.f32.mrf.mxu2  ;;  %v2396_v29 = vpop.f32.mrf.mxu3 }
0x1972   : > { %v2384_v60 = vadd.f32 %v2383_v59, %v2277_v58 }
0x1974   : > { %v2397_v61 = vadd.f32 %v2396_v29, %v2384_v60 }
0x1976   : > { %v2400_v62 = vsub.f32 0.0, %v2397_v61 }
0x1978   : > { %v2401_v63 = vmul.f32 1.442695, %v2400_v62 }
0x1979   : > { %v2385_v0 = vpop.f32.mrf.mxu2  ;;  %v2398_v1 = vpop.f32.mrf.mxu3 }
0x197a   : > { %3213 = vpow2.f32 %v2401_v63 }
0x1980   : > { %v3214_v2 = vpop.eup %3213 }
0x1981   : > { %v2403_v3 = vadd.f32 1.0, %v3214_v2 }
0x1983   : > { %3215 = vrcp.f32 %v2403_v3  ;;  %v2415_v10 = vand.u32 2147483648, %v2403_v3  ;;  %v2413_v4 = vand.u32 2147483647, %v2403_v3  ;;  %vm2409_vm2 = vweird.f32 %v2403_v3 }
0x1985   : > { %v2416_v14 = vor.u32 1.1754944e-38, %v2415_v10  ;;  %vm2414_vm4 = vcmp.eq.f32.partialorder %v2413_v4, 8.507059e+37 }
0x1989   : > { %v3216_v6 = vpop.eup %3215 }
0x198a   : > { %v2405_v8 = vmul.f32 %v3216_v6, %v2403_v3  ;;  %vm2410_vm0 = vweird.f32 %v3216_v6 }
0x198b   : > { %vm2411_vm3 = vmor %vm2409_vm2, %vm2410_vm0 }
0x198c   : > { %v2406_v9 = vsub.f32 1.0, %v2405_v8 }
0x198e   : > { %v2407_v12 = vmul.f32 %v3216_v6, %v2406_v9 }
0x1990   : > { %v2408_v13 = vadd.f32 %v3216_v6, %v2407_v12 }
0x1992   : > { %v2412_v15 = vsel %vm2411_vm3, %v3216_v6, %v2408_v13 }
0x1993   : > { %v2417_v16 = vsel %vm2414_vm4, %v2416_v14, %v2412_v15 }
0x1994   : > { %2419 = vst [vmem:[%s441_s24] sm:$0x1] %v2417_v16 }
0x1995   : > { %3245 = shalt.err (!%p3242_p3)
}
0x1996   : > { %3088 = dma.vmem_to_hbm [thread:$0]  (%p3391_p5), %s2432_s30, 16, %s2434_s16, %s2421_s20  }
0x1997 PF: > { %p3094_p4 = scmp.ge.s32.totalorder %s3280_s28, 2  ;;  %s2445_s23 = sand.u32 1, %s3268_s25  }
0x1998   : > { %s2446_s24 = scalar_lea.sflag [#allocation3], %s2445_s23 }
0x1999   : > { %p3091_p7 = pnand %p3094_p4, %p3395_p6 }
0x199b   : > { %p3092_p8 = pneg %p3091_p7 }
0x199d   : > { %3263 = dma.done.wait (%p3092_p8), %s2446_s24, 16  }
0x199e   : > { %3265 = vsyncadd (%p3092_p8), %s2446_s24, 4294967280  ;;  %s4031_s28 = sld [smem:[#allocation6_spill]]  ;;  %s4034_s25 = smov %s3272_s26 }
0x199f   : > { %s4032_s29 = sld [smem:[#allocation5_spill]] }
0x19a0   : > { %s4033_s27 = sld [smem:[#allocation7_spill]] }
0x19a4   : > { %p23_p9 = scmp.ge.s32.totalorder %s4031_s28, 4  }
0x19a5   : > { %s4035_s26 = smov %s4032_s29 }
0x19a6   :  { %25 = sbr.rel (!%p23_p9) target bundleno = 3 (0x3), region = 145 }
0x19ab   :  { %2451 = vsyncpa [#allocation3], 1 }
0x19ac   :  { %2453 = vsyncpa [#allocation3 + $0x1], 1 }

</bundles_post_ra>
